<compile_context>
chip_gen: v7x
topology: tpu7x:2x2x1
jax: 0.10.0
libtpu: 0.0.40
codegen_flags: <defaults>
</compile_context>

<pallas_src>
import functools

import jax
import jax.numpy as jnp
from jax.experimental import pallas as pl
from jax.experimental.pallas import tpu as pltpu

HID1, HID2 = 400, 300          # logical hidden sizes (PyTorch module)
HID1_P, HID2_P = 512, 384      # 128-aligned padded hidden sizes
OUT_W = 8                      # narrow output slab: q1 in lane 0, q2 in lane 1


def _round_up(x, m):
    return ((x + m - 1) // m) * m


# --------------------------------------------------------------------------- #
# Kernel
# --------------------------------------------------------------------------- #
def twin_q_kernel(s_ref, a_ref,
                  w1_s_ref, w1_a_ref, b1_ref,
                  w2n1_ref, b2n1_ref, w2n2_ref, b2n2_ref,
                  w3n1_ref, w3n2_ref, b3_ref,
                  q_ref):
    """Both critic MLPs (in -> 512 -> 384 -> 1, ReLU), layer-1 fused across critics."""
    cdt = w1_s_ref.dtype   # MXU input dtype (bf16 weights by default)
    edt = b1_ref.dtype     # elementwise dtype: bf16 on v6e/v7x (bf16 VALU), f32 on v5e

    s = s_ref[...].astype(cdt)
    a = a_ref[...].astype(cdt)

    # Layer 1, both critics fused along lanes: (bb, 1024), f32 MXU accumulation.
    acc1 = (jnp.dot(s, w1_s_ref[...], preferred_element_type=jnp.float32)
            + jnp.dot(a, w1_a_ref[...], preferred_element_type=jnp.float32))
    # Single cast to edt, then bias + ReLU in edt. With edt=bf16 this halves the
    # VALU work on the 1024-wide hidden and replaces the two later h/g casts.
    hg = jnp.maximum(acc1.astype(edt) + b1_ref[...], 0.0)
    h = hg[:, :HID1_P]                         # net1 hidden, 128-aligned lane slice
    g = hg[:, HID1_P:]                         # net2 hidden

    # Layer 2 (padded rows/cols are zero -> exact).
    h2 = jnp.maximum(
        jnp.dot(h.astype(cdt), w2n1_ref[...],
                preferred_element_type=jnp.float32).astype(edt) + b2n1_ref[...], 0.0)
    g2 = jnp.maximum(
        jnp.dot(g.astype(cdt), w2n2_ref[...],
                preferred_element_type=jnp.float32).astype(edt) + b2n2_ref[...], 0.0)

    # Layer 3 (out_features == 1): VPU multiply + cross-lane reduce instead of a
    # degenerate N=1 MXU matmul. w3 rows are f32 and zero-padded, so the products
    # and the reduction accumulate in f32 -> exact w.r.t. the bf16 activations.
    q1 = jnp.sum(h2.astype(jnp.float32) * w3n1_ref[...], axis=-1, keepdims=True)
    q2 = jnp.sum(g2.astype(jnp.float32) * w3n2_ref[...], axis=-1, keepdims=True)

    # Narrow (bb, 8) store: q1 -> lane 0, q2 -> lane 1, biases folded into b3 row.
    lane = jax.lax.broadcasted_iota(jnp.int32, q_ref.shape, 1)
    q_ref[...] = (jnp.where(lane == 0, q1, jnp.where(lane == 1, q2, 0.0))
                  + b3_ref[...])


# --------------------------------------------------------------------------- #
# Wrapper
# --------------------------------------------------------------------------- #
def q_critic_forward(state, action, packed_params, *, block_b=512):
    """Pallas equivalent of Q_critic.forward -> (q1, q2), each (B, 1) float32."""
    B, sd = state.shape
    ad = action.shape[1]

    # Batch tiling: aim for >= 2 tiles (so v7x's two TensorCores both get work via
    # dimension_semantics=("parallel",)) and prefer an exact split to avoid padding.
    if B < 16:
        bb, b_pad = B, B
    else:
        nt = max(2, -(-B // block_b))
        if B % (8 * nt) == 0:
            bb = B // nt                      # exact split, no padded copies
        else:
            bb = _round_up(-(-B // nt), 8)
        b_pad = _round_up(B, bb)

    if b_pad != B:
        # TODO(synk): handle the ragged last tile with an in-kernel row mask to
        # avoid materializing padded copies of state/action for very large B.
        pad = b_pad - B
        state = jnp.pad(state, ((0, pad), (0, 0)))
        action = jnp.pad(action, ((0, pad), (0, 0)))

    grid = (b_pad // bb,)

    def batch_spec(feat):
        return pl.BlockSpec((bb, feat), lambda i: (i, 0))

    def pinned_spec(shape):
        # Same block every grid step -> weights stay resident in VMEM.
        return pl.BlockSpec(shape, lambda i: (0, 0))

    in_specs = ([batch_spec(sd), batch_spec(ad)]
                + [pinned_spec(p.shape) for p in packed_params])
    out_specs = pl.BlockSpec((bb, OUT_W), lambda i: (i, 0))

    # Weights are resident across the grid -> count them once (review fix).
    weight_bytes = sum(int(p.size) * jnp.dtype(p.dtype).itemsize for p in packed_params)
    act_in_bytes = (int(state.size) + int(action.size)) * 4
    out_bytes = b_pad * OUT_W * 4
    flops = 2 * b_pad * ((sd + ad) * 2 * HID1_P + 2 * HID1_P * HID2_P + 2 * HID2_P)

    q = pl.pallas_call(
        twin_q_kernel,
        out_shape=jax.ShapeDtypeStruct((b_pad, OUT_W), jnp.float32),
        grid=grid,
        in_specs=in_specs,
        out_specs=out_specs,
        compiler_params=pltpu.CompilerParams(dimension_semantics=("parallel",)),
        cost_estimate=pl.CostEstimate(
            flops=int(flops), transcendentals=0,
            bytes_accessed=int(weight_bytes + act_in_bytes + out_bytes)),
    )(state, action, *packed_params)

    return q[:B, 0:1], q[:B, 1:2]


# --------------------------------------------------------------------------- #
# Parameter init / packing
# --------------------------------------------------------------------------- #
def init_linear(key, in_f, out_f):
    """PyTorch nn.Linear default init, stored as W:(in, out), b:(out,)."""
    kw, kb = jax.random.split(key)
    bound = 1.0 / jnp.sqrt(jnp.float32(in_f))
    w = jax.random.uniform(kw, (in_f, out_f), jnp.float32, -bound, bound)
    b = jax.random.uniform(kb, (out_f,), jnp.float32, -bound, bound)
    return w, b


def init_q_critic_params(key, state_dim, action_dim):
    """Raw (unpadded) parameters matching the PyTorch module."""
    in_dim = state_dim + action_dim
    keys = jax.random.split(key, 6)
    w1a, b1a = init_linear(keys[0], in_dim, HID1)
    w2a, b2a = init_linear(keys[1], HID1, HID2)
    w3a, b3a = init_linear(keys[2], HID2, 1)
    w1b, b1b = init_linear(keys[3], in_dim, HID1)
    w2b, b2b = init_linear(keys[4], HID1, HID2)
    w3b, b3b = init_linear(keys[5], HID2, 1)
    return (w1a, b1a, w2a, b2a, w3a, b3a,
            w1b, b1b, w2b, b2b, w3b, b3b)


def pack_q_critic_params(raw, state_dim, action_dim,
                         weight_dtype=jnp.bfloat16, elem_dtype=jnp.bfloat16):
    """Zero-pad to 128-aligned shapes and fuse the twin layer-1 weights.

    weight_dtype: MXU streaming dtype for W1/W2 (bf16 halves weight DMA).
    elem_dtype:   dtype of the bias/ReLU path (bf16 for v6e/v7x bf16 VALU;
                  use jnp.float32 on v5e, which has no bf16 VPU).
    Padding is exact: padded weight rows/cols and bias lanes are zero, and
    ReLU(0) = 0, so padded lanes never contribute to the outputs.
    """
    (w1a, b1a, w2a, b2a, w3a, b3a,
     w1b, b1b, w2b, b2b, w3b, b3b) = raw
    in_dim = state_dim + action_dim

    w1_fused = jnp.zeros((in_dim, 2 * HID1_P), jnp.float32)
    w1_fused = w1_fused.at[:, :HID1].set(w1a)
    w1_fused = w1_fused.at[:, HID1_P:HID1_P + HID1].set(w1b)
    b1_fused = jnp.zeros((1, 2 * HID1_P), jnp.float32)
    b1_fused = b1_fused.at[0, :HID1].set(b1a)
    b1_fused = b1_fused.at[0, HID1_P:HID1_P + HID1].set(b1b)

    def pad_w2(w):
        return jnp.zeros((HID1_P, HID2_P), jnp.float32).at[:HID1, :HID2].set(w)

    def pad_b2(b):
        return jnp.zeros((1, HID2_P), jnp.float32).at[0, :HID2].set(b)

    def row_w3(w):  # (HID2, 1) -> (1, HID2_P) row, kept f32 (VPU path, f32 accum)
        return jnp.zeros((1, HID2_P), jnp.float32).at[0, :HID2].set(w[:, 0])

    b3_row = jnp.zeros((1, OUT_W), jnp.float32)
    b3_row = b3_row.at[0, 0].set(b3a[0]).at[0, 1].set(b3b[0])

    wd, ed = weight_dtype, elem_dtype
    return (w1_fused[:state_dim].astype(wd),   # W1 block multiplied by state
            w1_fused[state_dim:].astype(wd),   # W1 block multiplied by action
            b1_fused.astype(ed),
            pad_w2(w2a).astype(wd), pad_b2(b2a).astype(ed),
            pad_w2(w2b).astype(wd), pad_b2(b2b).astype(ed),
            row_w3(w3a), row_w3(w3b),
            b3_row)


# --------------------------------------------------------------------------- #
# Pure-JAX references
# --------------------------------------------------------------------------- #
def q_critic_forward_ref(state, action, raw,
                         compute_dtype=jnp.float32, elem_dtype=jnp.float32):
    """Reference of the PyTorch module.  compute_dtype / elem_dtype = bf16
    reproduces the kernel's exact rounding and op order (f32 MXU accumulation,
    bias/ReLU in elem_dtype, split layer-1 matmul, f32 final reduction)."""
    (w1a, b1a, w2a, b2a, w3a, b3a,
     w1b, b1b, w2b, b2b, w3b, b3b) = raw
    sd = state.shape[1]
    cdt, edt = compute_dtype, elem_dtype

    def mm(x, w):
        return jnp.dot(x.astype(cdt), w.astype(cdt),
                       preferred_element_type=jnp.float32)

    def net(w1, b1, w2, b2, w3, b3):
        acc = mm(state, w1[:sd]) + mm(action, w1[sd:])
        h = jax.nn.relu(acc.astype(edt) + b1.astype(edt))
        h2 = jax.nn.relu(mm(h, w2).astype(edt) + b2.astype(edt))
        return jnp.dot(h2.astype(jnp.float32), w3) + b3

    return (net(w1a, b1a, w2a, b2a, w3a, b3a),
            net(w1b, b1b, w2b, b2b, w3b, b3b))


# --------------------------------------------------------------------------- #
# Demo / correctness check
# --------------------------------------------------------------------------- #
if __name__ == "__main__":
    key = jax.random.PRNGKey(0)
    k_params, k_state, k_action = jax.random.split(key, 3)

    batch, state_dim, action_dim = 2, 8, 4
    raw_params = init_q_critic_params(k_params, state_dim, action_dim)
    packed = pack_q_critic_params(raw_params, state_dim, action_dim,
                                  weight_dtype=jnp.bfloat16,
                                  elem_dtype=jnp.bfloat16)

    state = jax.random.normal(k_state, (batch, state_dim), jnp.float32)
    action = jax.random.normal(k_action, (batch, action_dim), jnp.float32)

    fwd = jax.jit(functools.partial(q_critic_forward, block_b=512))
    q1, q2 = fwd(state, action, packed)
    q1 = jax.block_until_ready(q1)
    q2 = jax.block_until_ready(q2)

    assert q1.shape == (batch, 1) and q2.shape == (batch, 1)

    # Tight check against a reference that applies the same bf16 weight/activation
    # rounding and op order the kernel uses.
    q1_bf, q2_bf = q_critic_forward_ref(state, action, raw_params,
                                        compute_dtype=jnp.bfloat16,
                                        elem_dtype=jnp.bfloat16)
    assert jnp.allclose(q1, q1_bf, atol=1e-3, rtol=1e-2)
    assert jnp.allclose(q2, q2_bf, atol=1e-3, rtol=1e-2)

    # Loose sanity check against the exact f32 semantics of the PyTorch module
    # (differences are only due to bf16 weight streaming / bf16 bias-ReLU path).
    q1_f32, q2_f32 = q_critic_forward_ref(state, action, raw_params,
                                          compute_dtype=jnp.float32,
                                          elem_dtype=jnp.float32)
    assert jnp.allclose(q1, q1_f32, atol=5e-2, rtol=5e-2)
    assert jnp.allclose(q2, q2_f32, atol=5e-2, rtol=5e-2)

    print("KERNEL_OK")
</pallas_src>

<mosaic_0001>
module attributes {stable_mosaic.version = 11 : i64} {
  func.func @twin_q_kernel(%arg0: i32, %arg1: memref<2x8xf32, #tpu.memory_space<vmem>>, %arg2: memref<2x4xf32, #tpu.memory_space<vmem>>, %arg3: memref<8x1024xbf16, #tpu.memory_space<vmem>>, %arg4: memref<4x1024xbf16, #tpu.memory_space<vmem>>, %arg5: memref<1x1024xbf16, #tpu.memory_space<vmem>>, %arg6: memref<512x384xbf16, #tpu.memory_space<vmem>>, %arg7: memref<1x384xbf16, #tpu.memory_space<vmem>>, %arg8: memref<512x384xbf16, #tpu.memory_space<vmem>>, %arg9: memref<1x384xbf16, #tpu.memory_space<vmem>>, %arg10: memref<1x384xf32, #tpu.memory_space<vmem>>, %arg11: memref<1x384xf32, #tpu.memory_space<vmem>>, %arg12: memref<1x8xf32, #tpu.memory_space<vmem>>, %arg13: memref<2x8xf32, #tpu.memory_space<vmem>>) attributes {dimension_semantics = [#tpu.dimension_semantics<parallel>], iteration_bounds = array<i64: 1>, scalar_prefetch = 0 : i64, scratch_operands = 0 : i64, tpu.core_type = #tpu.core_type<tc>, window_params = [{transform_indices = @transform_0, window_bounds = array<i64: 2, 8>}, {transform_indices = @transform_1, window_bounds = array<i64: 2, 4>}, {pipeline_mode = #tpu.pipeline_mode<synchronous>, transform_indices = @transform_2, window_bounds = array<i64: 8, 1024>}, {pipeline_mode = #tpu.pipeline_mode<synchronous>, transform_indices = @transform_3, window_bounds = array<i64: 4, 1024>}, {pipeline_mode = #tpu.pipeline_mode<synchronous>, transform_indices = @transform_4, window_bounds = array<i64: 1, 1024>}, {pipeline_mode = #tpu.pipeline_mode<synchronous>, transform_indices = @transform_5, window_bounds = array<i64: 512, 384>}, {pipeline_mode = #tpu.pipeline_mode<synchronous>, transform_indices = @transform_6, window_bounds = array<i64: 1, 384>}, {pipeline_mode = #tpu.pipeline_mode<synchronous>, transform_indices = @transform_7, window_bounds = array<i64: 512, 384>}, {pipeline_mode = #tpu.pipeline_mode<synchronous>, transform_indices = @transform_8, window_bounds = array<i64: 1, 384>}, {pipeline_mode = #tpu.pipeline_mode<synchronous>, transform_indices = @transform_9, window_bounds = array<i64: 1, 384>}, {pipeline_mode = #tpu.pipeline_mode<synchronous>, transform_indices = @transform_10, window_bounds = array<i64: 1, 384>}, {pipeline_mode = #tpu.pipeline_mode<synchronous>, transform_indices = @transform_11, window_bounds = array<i64: 1, 8>}, {transform_indices = @transform_12, window_bounds = array<i64: 2, 8>}]} {
    %c0 = arith.constant 0 : index
    %c0_0 = arith.constant 0 : index
    %0 = vector.load %arg1[%c0, %c0_0] : memref<2x8xf32, #tpu.memory_space<vmem>>, vector<2x8xf32>
    %1 = arith.truncf %0 : vector<2x8xf32> to vector<2x8xbf16>
    %c0_1 = arith.constant 0 : index
    %c0_2 = arith.constant 0 : index
    %2 = vector.load %arg2[%c0_1, %c0_2] : memref<2x4xf32, #tpu.memory_space<vmem>>, vector<2x4xf32>
    %3 = arith.truncf %2 : vector<2x4xf32> to vector<2x4xbf16>
    %c0_3 = arith.constant 0 : index
    %c0_4 = arith.constant 0 : index
    %4 = vector.load %arg3[%c0_3, %c0_4] : memref<8x1024xbf16, #tpu.memory_space<vmem>>, vector<8x1024xbf16>
    %cst = arith.constant dense<0.000000e+00> : vector<2x1024xf32>
    %5 = tpu.matmul %1, %4, %cst {dimension_numbers = #tpu.dot_dimension_numbers<[1], [0], [0], [1], [0, 0, 1, 1], [], []>} : vector<2x8xbf16>, vector<8x1024xbf16>, vector<2x1024xf32> -> vector<2x1024xf32>
    %c0_5 = arith.constant 0 : index
    %c0_6 = arith.constant 0 : index
    %6 = vector.load %arg4[%c0_5, %c0_6] : memref<4x1024xbf16, #tpu.memory_space<vmem>>, vector<4x1024xbf16>
    %cst_7 = arith.constant dense<0.000000e+00> : vector<2x1024xf32>
    %7 = tpu.matmul %3, %6, %cst_7 {dimension_numbers = #tpu.dot_dimension_numbers<[1], [0], [0], [1], [0, 0, 1, 1], [], []>} : vector<2x4xbf16>, vector<4x1024xbf16>, vector<2x1024xf32> -> vector<2x1024xf32>
    %8 = arith.addf %5, %7 : vector<2x1024xf32>
    %9 = arith.truncf %8 : vector<2x1024xf32> to vector<2x1024xbf16>
    %c0_8 = arith.constant 0 : index
    %c0_9 = arith.constant 0 : index
    %10 = vector.load %arg5[%c0_8, %c0_9] : memref<1x1024xbf16, #tpu.memory_space<vmem>>, vector<1x1024xbf16>
    %11 = vector.broadcast %10 : vector<1x1024xbf16> to vector<2x1024xbf16>
    %12 = arith.addf %9, %11 : vector<2x1024xbf16>
    %cst_10 = arith.constant 0.000000e+00 : bf16
    %13 = vector.broadcast %cst_10 : bf16 to vector<2x1024xbf16>
    %14 = arith.maximumf %12, %13 : vector<2x1024xbf16>
    %15 = vector.extract_strided_slice %14 {offsets = [0, 0], sizes = [2, 512], strides = [1, 1]} : vector<2x1024xbf16> to vector<2x512xbf16>
    %16 = vector.extract_strided_slice %14 {offsets = [0, 512], sizes = [2, 512], strides = [1, 1]} : vector<2x1024xbf16> to vector<2x512xbf16>
    %c0_11 = arith.constant 0 : index
    %c0_12 = arith.constant 0 : index
    %17 = vector.load %arg6[%c0_11, %c0_12] : memref<512x384xbf16, #tpu.memory_space<vmem>>, vector<512x384xbf16>
    %cst_13 = arith.constant dense<0.000000e+00> : vector<2x384xf32>
    %18 = tpu.matmul %15, %17, %cst_13 {dimension_numbers = #tpu.dot_dimension_numbers<[1], [0], [0], [1], [0, 0, 1, 1], [], []>} : vector<2x512xbf16>, vector<512x384xbf16>, vector<2x384xf32> -> vector<2x384xf32>
    %19 = arith.truncf %18 : vector<2x384xf32> to vector<2x384xbf16>
    %c0_14 = arith.constant 0 : index
    %c0_15 = arith.constant 0 : index
    %20 = vector.load %arg7[%c0_14, %c0_15] : memref<1x384xbf16, #tpu.memory_space<vmem>>, vector<1x384xbf16>
    %21 = vector.broadcast %20 : vector<1x384xbf16> to vector<2x384xbf16>
    %22 = arith.addf %19, %21 : vector<2x384xbf16>
    %cst_16 = arith.constant 0.000000e+00 : bf16
    %23 = vector.broadcast %cst_16 : bf16 to vector<2x384xbf16>
    %24 = arith.maximumf %22, %23 : vector<2x384xbf16>
    %c0_17 = arith.constant 0 : index
    %c0_18 = arith.constant 0 : index
    %25 = vector.load %arg8[%c0_17, %c0_18] : memref<512x384xbf16, #tpu.memory_space<vmem>>, vector<512x384xbf16>
    %cst_19 = arith.constant dense<0.000000e+00> : vector<2x384xf32>
    %26 = tpu.matmul %16, %25, %cst_19 {dimension_numbers = #tpu.dot_dimension_numbers<[1], [0], [0], [1], [0, 0, 1, 1], [], []>} : vector<2x512xbf16>, vector<512x384xbf16>, vector<2x384xf32> -> vector<2x384xf32>
    %27 = arith.truncf %26 : vector<2x384xf32> to vector<2x384xbf16>
    %c0_20 = arith.constant 0 : index
    %c0_21 = arith.constant 0 : index
    %28 = vector.load %arg9[%c0_20, %c0_21] : memref<1x384xbf16, #tpu.memory_space<vmem>>, vector<1x384xbf16>
    %29 = vector.broadcast %28 : vector<1x384xbf16> to vector<2x384xbf16>
    %30 = arith.addf %27, %29 : vector<2x384xbf16>
    %cst_22 = arith.constant 0.000000e+00 : bf16
    %31 = vector.broadcast %cst_22 : bf16 to vector<2x384xbf16>
    %32 = arith.maximumf %30, %31 : vector<2x384xbf16>
    %33 = arith.extf %24 : vector<2x384xbf16> to vector<2x384xf32>
    %c0_23 = arith.constant 0 : index
    %c0_24 = arith.constant 0 : index
    %34 = vector.load %arg10[%c0_23, %c0_24] : memref<1x384xf32, #tpu.memory_space<vmem>>, vector<1x384xf32>
    %35 = vector.broadcast %34 : vector<1x384xf32> to vector<2x384xf32>
    %36 = arith.mulf %33, %35 : vector<2x384xf32>
    %cst_25 = arith.constant dense<0.000000e+00> : vector<2xf32>
    %37 = vector.multi_reduction <add>, %36, %cst_25 [1] : vector<2x384xf32> to vector<2xf32>
    %38 = vector.shape_cast %37 : vector<2xf32> to vector<2x1xf32>
    %39 = arith.extf %32 : vector<2x384xbf16> to vector<2x384xf32>
    %c0_26 = arith.constant 0 : index
    %c0_27 = arith.constant 0 : index
    %40 = vector.load %arg11[%c0_26, %c0_27] : memref<1x384xf32, #tpu.memory_space<vmem>>, vector<1x384xf32>
    %41 = vector.broadcast %40 : vector<1x384xf32> to vector<2x384xf32>
    %42 = arith.mulf %39, %41 : vector<2x384xf32>
    %cst_28 = arith.constant dense<0.000000e+00> : vector<2xf32>
    %43 = vector.multi_reduction <add>, %42, %cst_28 [1] : vector<2x384xf32> to vector<2xf32>
    %44 = vector.shape_cast %43 : vector<2xf32> to vector<2x1xf32>
    %45 = tpu.iota {dimensions = array<i32: 1>} : vector<2x8xi32>
    %c0_i32 = arith.constant 0 : i32
    %46 = vector.broadcast %c0_i32 : i32 to vector<2x8xi32>
    %47 = arith.cmpi eq, %45, %46 : vector<2x8xi32>
    %c1_i32 = arith.constant 1 : i32
    %48 = vector.broadcast %c1_i32 : i32 to vector<2x8xi32>
    %49 = arith.cmpi eq, %45, %48 : vector<2x8xi32>
    %cst_29 = arith.constant 0.000000e+00 : f32
    %50 = vector.shape_cast %44 : vector<2x1xf32> to vector<2x1xf32>
    %51 = vector.broadcast %50 : vector<2x1xf32> to vector<2x8xf32>
    %52 = vector.broadcast %cst_29 : f32 to vector<2x8xf32>
    %53 = arith.select %49, %51, %52 : vector<2x8xi1>, vector<2x8xf32>
    %54 = vector.shape_cast %38 : vector<2x1xf32> to vector<2x1xf32>
    %55 = vector.broadcast %54 : vector<2x1xf32> to vector<2x8xf32>
    %56 = arith.select %47, %55, %53 : vector<2x8xi1>, vector<2x8xf32>
    %c0_30 = arith.constant 0 : index
    %c0_31 = arith.constant 0 : index
    %57 = vector.load %arg12[%c0_30, %c0_31] : memref<1x8xf32, #tpu.memory_space<vmem>>, vector<1x8xf32>
    %58 = vector.broadcast %57 : vector<1x8xf32> to vector<2x8xf32>
    %59 = arith.addf %56, %58 : vector<2x8xf32>
    %c0_32 = arith.constant 0 : index
    %c0_33 = arith.constant 0 : index
    %60 = vector.load %arg13[%c0_32, %c0_33] : memref<2x8xf32, #tpu.memory_space<vmem>>, vector<2x8xf32>
    tpu.vector_store %arg13[%c0_32, %c0_33], %59 {strides = array<i32>} : memref<2x8xf32, #tpu.memory_space<vmem>>, vector<2x8xf32>,
    return
  }
  func.func @transform_0(%arg0: i32) -> (i32, i32) {
    %c0_i32 = arith.constant 0 : i32
    %c0_i32_0 = arith.constant 0 : i32
    return %arg0, %c0_i32 : i32, i32
  }
  func.func @transform_1(%arg0: i32) -> (i32, i32) {
    %c0_i32 = arith.constant 0 : i32
    %c0_i32_0 = arith.constant 0 : i32
    return %arg0, %c0_i32 : i32, i32
  }
  func.func @transform_2(%arg0: i32) -> (i32, i32) {
    %c0_i32 = arith.constant 0 : i32
    %c0_i32_0 = arith.constant 0 : i32
    %c0_i32_1 = arith.constant 0 : i32
    return %c0_i32, %c0_i32_0 : i32, i32
  }
  func.func @transform_3(%arg0: i32) -> (i32, i32) {
    %c0_i32 = arith.constant 0 : i32
    %c0_i32_0 = arith.constant 0 : i32
    %c0_i32_1 = arith.constant 0 : i32
    return %c0_i32, %c0_i32_0 : i32, i32
  }
  func.func @transform_4(%arg0: i32) -> (i32, i32) {
    %c0_i32 = arith.constant 0 : i32
    %c0_i32_0 = arith.constant 0 : i32
    %c0_i32_1 = arith.constant 0 : i32
    return %c0_i32, %c0_i32_0 : i32, i32
  }
  func.func @transform_5(%arg0: i32) -> (i32, i32) {
    %c0_i32 = arith.constant 0 : i32
    %c0_i32_0 = arith.constant 0 : i32
    %c0_i32_1 = arith.constant 0 : i32
    return %c0_i32, %c0_i32_0 : i32, i32
  }
  func.func @transform_6(%arg0: i32) -> (i32, i32) {
    %c0_i32 = arith.constant 0 : i32
    %c0_i32_0 = arith.constant 0 : i32
    %c0_i32_1 = arith.constant 0 : i32
    return %c0_i32, %c0_i32_0 : i32, i32
  }
  func.func @transform_7(%arg0: i32) -> (i32, i32) {
    %c0_i32 = arith.constant 0 : i32
    %c0_i32_0 = arith.constant 0 : i32
    %c0_i32_1 = arith.constant 0 : i32
    return %c0_i32, %c0_i32_0 : i32, i32
  }
  func.func @transform_8(%arg0: i32) -> (i32, i32) {
    %c0_i32 = arith.constant 0 : i32
    %c0_i32_0 = arith.constant 0 : i32
    %c0_i32_1 = arith.constant 0 : i32
    return %c0_i32, %c0_i32_0 : i32, i32
  }
  func.func @transform_9(%arg0: i32) -> (i32, i32) {
    %c0_i32 = arith.constant 0 : i32
    %c0_i32_0 = arith.constant 0 : i32
    %c0_i32_1 = arith.constant 0 : i32
    return %c0_i32, %c0_i32_0 : i32, i32
  }
  func.func @transform_10(%arg0: i32) -> (i32, i32) {
    %c0_i32 = arith.constant 0 : i32
    %c0_i32_0 = arith.constant 0 : i32
    %c0_i32_1 = arith.constant 0 : i32
    return %c0_i32, %c0_i32_0 : i32, i32
  }
  func.func @transform_11(%arg0: i32) -> (i32, i32) {
    %c0_i32 = arith.constant 0 : i32
    %c0_i32_0 = arith.constant 0 : i32
    %c0_i32_1 = arith.constant 0 : i32
    return %c0_i32, %c0_i32_0 : i32, i32
  }
  func.func @transform_12(%arg0: i32) -> (i32, i32) {
    %c0_i32 = arith.constant 0 : i32
    %c0_i32_0 = arith.constant 0 : i32
    return %arg0, %c0_i32 : i32, i32
  }
}

</mosaic_0001>

<bundles_post_ra>
// kernel: q_critic_forward.1
= control target key start
LH: loop header
LB: loop body
LE: loop exit
PB: predicated region body
PF: predicated region fallthrough
CT: control target
= control target key end

     0   :  { %17 = vsyncpa [#allocation3], 0  ;;  %s3549_s0 = inlined_call_operand.hbm [shape: f32[2,8], index: 0, kind: input, shape index: {}]   ;;  %s3550_s1 = inlined_call_operand.hbm [shape: f32[2,4], index: 1, kind: input, shape index: {}]   ;;  %s3551_s2 = inlined_call_operand.hbm [shape: bf16[8,1024], index: 2, kind: input, shape index: {}]   ;;  %s3552_s3 = inlined_call_operand.hbm [shape: bf16[4,1024], index: 3, kind: input, shape index: {}]   ;;  %s3553_s4 = inlined_call_operand.vmem [shape: bf16[1,1024], index: 4, kind: input, shape index: {}]   ;;  %s3554_s5 = inlined_call_operand.hbm [shape: bf16[512,384], index: 5, kind: input, shape index: {}]   ;;  %s3555_s6 = inlined_call_operand.vmem [shape: bf16[1,384], index: 6, kind: input, shape index: {}]   ;;  %s3556_s7 = inlined_call_operand.hbm [shape: bf16[512,384], index: 7, kind: input, shape index: {}]   ;;  %s3557_s8 = inlined_call_operand.vmem [shape: bf16[1,384], index: 8, kind: input, shape index: {}]   ;;  %s3558_s9 = inlined_call_operand.vmem [shape: f32[1,384], index: 9, kind: input, shape index: {}]   ;;  %s3559_s10 = inlined_call_operand.vmem [shape: f32[1,384], index: 10, kind: input, shape index: {}]   ;;  %s3560_s11 = inlined_call_operand.vmem [shape: f32[1,8], index: 11, kind: input, shape index: {}]   ;;  %s3561_s12 = inlined_call_operand.vmem [shape: f32[2,8], index: 12, kind: output, shape index: {}]  }
   0x1   :  { %18 = vsyncpa [#allocation5], 0 }
   0x2   :  { %19 = vsyncpa [#allocation8], 0 }
   0x3   :  { %20 = vsyncpa [#allocation11], 0  ;;  %s3246_s21 = smov [#allocation4]   ;;  %s3247_s23 = smov [#allocation7]  }
   0x4   :  { %s37_s22 = sshll.u32 %s3246_s21, 4  ;;  %s57_s24 = sshll.u32 %s3247_s23, 4  ;;  %s38_s22 = int_to_ptr.vmem [resolvable:$true] %s37_s22  ;;  %s58_s24 = int_to_ptr.vmem [resolvable:$true] %s57_s24 }
   0x5   :  { %s3106_s27 = scalar_lea.hbm %s3550_s1, 32 }
   0x6   :  { %p3107_p0 = scmp.ne.s32.totalorder %s3550_s1, %s3106_s27  ;;  %p3110_p1 = scmp.lt.u32.totalorder %s3106_s27, %s3550_s1 }
   0x8   :  { %p3112_p2 = pnand %p3110_p1, %p3107_p0 }
   0xa   :  { %3115 = shalt.err (!%p3112_p2)
}
   0xb   :  { %s3116_s14 = scalar_lea.vmem %s38_s22, 32  ;;  %p3121_p4 = scmp.lt.s32.totalorder %s38_s22, %s38_s22 }
   0xc   :  { %p3117_p3 = scmp.ne.s32.totalorder %s38_s22, %s3116_s14  ;;  %p3122_p5 = scmp.lt.s32.totalorder %s3116_s14, %s3116_s14 }
   0xe   :  { %p3123_p6 = por %p3122_p5, %p3121_p4 }
  0x10   :  { %p3124_p7 = pnand %p3123_p6, %p3117_p3 }
  0x12   :  { %3127 = shalt.err (!%p3124_p7)
}
  0x13   :  { %40 = dma.hbm_to_vmem [thread:$0]  %s3550_s1, 32, %s38_s22, [#allocation5]  }
  0x14   :  { %s3128_s19 = scalar_lea.hbm %s3552_s3, 256 }
  0x15   :  { %p3129_p8 = scmp.ne.s32.totalorder %s3552_s3, %s3128_s19  ;;  %p3132_p9 = scmp.lt.u32.totalorder %s3128_s19, %s3552_s3 }
  0x17   :  { %p3134_p10 = pnand %p3132_p9, %p3129_p8 }
  0x19   :  { %3137 = shalt.err (!%p3134_p10)
}
  0x1a   :  { %s3138_s26 = scalar_lea.vmem %s58_s24, 256  ;;  %p3143_p12 = scmp.lt.s32.totalorder %s58_s24, %s58_s24 }
  0x1b   :  { %p3139_p11 = scmp.ne.s32.totalorder %s58_s24, %s3138_s26  ;;  %p3144_p13 = scmp.lt.s32.totalorder %s3138_s26, %s3138_s26 }
  0x1d   :  { %p3145_p0 = por %p3144_p13, %p3143_p12 }
  0x1f   :  { %p3146_p1 = pnand %p3145_p0, %p3139_p11 }
  0x21   :  { %3149 = shalt.err (!%p3146_p1)
}
  0x22   :  { %60 = dma.hbm_to_vmem [thread:$0]  %s3552_s3, 256, %s58_s24, [#allocation8]  }
  0x23   :  { %s3248_s27 = smov [#allocation2]   ;;  %s3249_s29 = smov [#allocation6]  }
  0x24   :  { %s27_s28 = sshll.u32 %s3248_s27, 4  ;;  %s47_s30 = sshll.u32 %s3249_s29, 4  ;;  %s28_s28 = int_to_ptr.vmem [resolvable:$true] %s27_s28  ;;  %s48_s30 = int_to_ptr.vmem [resolvable:$true] %s47_s30 }
  0x25   :  { %s3150_s15 = scalar_lea.hbm %s3549_s0, 32 }
  0x26   :  { %p3151_p2 = scmp.ne.s32.totalorder %s3549_s0, %s3150_s15  ;;  %p3154_p3 = scmp.lt.u32.totalorder %s3150_s15, %s3549_s0 }
  0x28   :  { %p3156_p4 = pnand %p3154_p3, %p3151_p2 }
  0x2a   :  { %3159 = shalt.err (!%p3156_p4)
}
  0x2b   :  { %s3160_s3 = scalar_lea.vmem %s28_s28, 32  ;;  %p3165_p6 = scmp.lt.s32.totalorder %s28_s28, %s28_s28 }
  0x2c   :  { %p3161_p5 = scmp.ne.s32.totalorder %s28_s28, %s3160_s3  ;;  %p3166_p7 = scmp.lt.s32.totalorder %s3160_s3, %s3160_s3 }
  0x2e   :  { %p3167_p8 = por %p3166_p7, %p3165_p6 }
  0x30   :  { %p3168_p9 = pnand %p3167_p8, %p3161_p5 }
  0x32   :  { %3171 = shalt.err (!%p3168_p9)
}
  0x33   :  { %30 = dma.hbm_to_vmem [thread:$0]  %s3549_s0, 32, %s28_s28, [#allocation3]  }
  0x34   :  { %s3172_s25 = scalar_lea.hbm %s3551_s2, 512 }
  0x35   :  { %p3173_p10 = scmp.ne.s32.totalorder %s3551_s2, %s3172_s25  ;;  %p3176_p11 = scmp.lt.u32.totalorder %s3172_s25, %s3551_s2 }
  0x37   :  { %p3178_p12 = pnand %p3176_p11, %p3173_p10 }
  0x39   :  { %3181 = shalt.err (!%p3178_p12)
}
  0x3a   :  { %s3182_s29 = scalar_lea.vmem %s48_s30, 512  ;;  %p3187_p0 = scmp.lt.s32.totalorder %s48_s30, %s48_s30 }
  0x3b   :  { %p3183_p13 = scmp.ne.s32.totalorder %s48_s30, %s3182_s29  ;;  %p3188_p1 = scmp.lt.s32.totalorder %s3182_s29, %s3182_s29 }
  0x3d   :  { %p3189_p2 = por %p3188_p1, %p3187_p0 }
  0x3f   :  { %p3190_p3 = pnand %p3189_p2, %p3183_p13 }
  0x41   :  { %3193 = shalt.err (!%p3190_p3)
}
  0x42   :  { %50 = dma.hbm_to_vmem [thread:$0]  %s3551_s2, 512, %s48_s30, [#allocation5]  }
  0x43   :  { %s3250_s13 = smov [#allocation9]   ;;  %s3194_s17 = scalar_lea.hbm %s3554_s5, 12288 }
  0x44   :  { %s68_s14 = sshll.u32 %s3250_s13, 4  ;;  %p3195_p4 = scmp.ne.s32.totalorder %s3554_s5, %s3194_s17  ;;  %s69_s14 = int_to_ptr.vmem [resolvable:$true] %s68_s14 }
  0x45   :  { %p3198_p5 = scmp.lt.u32.totalorder %s3194_s17, %s3554_s5 }
  0x47   :  { %p3200_p6 = pnand %p3198_p5, %p3195_p4 }
  0x49   :  { %3203 = shalt.err (!%p3200_p6)
}
  0x4a   :  { %s3204_s20 = scalar_lea.vmem %s69_s14, 12288  ;;  %p3209_p8 = scmp.lt.s32.totalorder %s69_s14, %s69_s14 }
  0x4b   :  { %p3205_p7 = scmp.ne.s32.totalorder %s69_s14, %s3204_s20  ;;  %p3210_p9 = scmp.lt.s32.totalorder %s3204_s20, %s3204_s20 }
  0x4d   :  { %p3211_p10 = por %p3210_p9, %p3209_p8 }
  0x4f   :  { %p3212_p11 = pnand %p3211_p10, %p3205_p7 }
  0x51   :  { %3215 = shalt.err (!%p3212_p11)
}
  0x52   :  { %s3251_s2 = smov 192   ;;  %s3252_s30 = smov 12  }
  0x53   :  { %74 = dma.hbm_to_vmem [thread:$0]  %s3554_s5, 12288, %s69_s14, [#allocation8], %s3251_s2, %s3251_s2, %s3252_s30  }
  0x54   :  { %s3253_s25 = smov [#allocation10]   ;;  %s3216_s27 = scalar_lea.hbm %s3556_s7, 12288 }
  0x55   :  { %s82_s26 = sshll.u32 %s3253_s25, 4  ;;  %p3217_p12 = scmp.ne.s32.totalorder %s3556_s7, %s3216_s27  ;;  %s83_s26 = int_to_ptr.vmem [resolvable:$true] %s82_s26 }
  0x56   :  { %p3220_p13 = scmp.lt.u32.totalorder %s3216_s27, %s3556_s7 }
  0x58   :  { %p3222_p0 = pnand %p3220_p13, %p3217_p12 }
  0x5a   :  { %3225 = shalt.err (!%p3222_p0)
}
  0x5b   :  { %s3226_s15 = scalar_lea.vmem %s83_s26, 12288  ;;  %p3231_p2 = scmp.lt.s32.totalorder %s83_s26, %s83_s26 }
  0x5c   :  { %p3227_p1 = scmp.ne.s32.totalorder %s83_s26, %s3226_s15  ;;  %p3232_p3 = scmp.lt.s32.totalorder %s3226_s15, %s3226_s15 }
  0x5e   :  { %p3233_p4 = por %p3232_p3, %p3231_p2 }
  0x60   :  { %p3234_p5 = pnand %p3233_p4, %p3227_p1 }
  0x62   :  { %3237 = shalt.err (!%p3234_p5)
}
  0x63   :  { %88 = dma.hbm_to_vmem [thread:$0]  %s3556_s7, 12288, %s83_s26, [#allocation11], %s3251_s2, %s3251_s2, %s3252_s30  }
  0x64   :  { %3238 = dma.done.wait [#allocation3], 32  }
  0x65   :  { %3239 = vsyncadd [#allocation3], 4294967264 }
  0x66   :  { %3240 = dma.done.wait [#allocation5], 544  }
  0x67   :  { %3241 = vsyncadd [#allocation5], 4294966752 }
  0x68   :  { %3242 = dma.done.wait [#allocation8], 12544  }
  0x69   :  { %3243 = vsyncadd [#allocation8], 4294954752 }
  0x6a   :  { %3244 = dma.done.wait [#allocation11], 12288  }
  0x6b   :  { %3245 = vsyncadd [#allocation11], 4294955008  ;;  %v132_v0 = vlaneseq  ;;  %v3254_v1 = vmov 1983009808   ;;  %v3255_v3 = vmov 0   ;;  %v124_v7 = vld [vmem:[#allocation7] sm:$0xff] }
  0x6c   :  { %v130_v2 = vunpack.c.l.s4 %v3254_v1  ;;  %223 = vmatprep.mubr.bf16.mxu0 %v3255_v3  ;;  %264 = vmatprep.mubr.bf16.mxu1 %v3255_v3  ;;  %vm166_vm0 = vcmask 1041408   ;;  %v125_v8 = vld [vmem:[#allocation7 + $0x8] sm:$0xff]  ;;  %v128_v11 = vcombine.high %v124_v7, %v124_v7  ;;  %v118_v12 = vld [vmem:[#allocation4] sm:$0x3]  ;;  %v120_v17 = vld [vmem:[#allocation6] sm:$0xff]  ;;  %vm162_vm1 = vcmask 31744  }
  0x6d   :  { %v3397_v4 = vshrl.u32 %v132_v0, 7  ;;  %v145_v13 = vcombine.high %v125_v8, %v125_v8  ;;  %v119_v20 = vpack.c.bf16 %v118_v12, %v118_v12  ;;  %v2506_v24 = vcombine.high %v120_v17, %v120_v17  ;;  %v121_v26 = vld [vmem:[#allocation6 + $0x8] sm:$0xff]  ;;  %v122_v30 = vld [vmem:[#allocation6 + $0x10] sm:$0xff]  ;;  %v123_v34 = vld [vmem:[#allocation6 + $0x18] sm:$0xff] }
  0x6e   :  { %v131_v5 = vunpack.c.0.s8 %v130_v2  ;;  %vm379_vm2 = vcmask 1043456   ;;  %v2508_v28 = vcombine.high %v121_v26, %v121_v26  ;;  %v2505_v29 = vcombine.low %v120_v17, %v120_v17  ;;  %v116_v35 = vld [vmem:[#allocation2] sm:$0x3]  ;;  %v2851_v42 = vld [vmem:[#allocation9 + $0x4] ss:$12 sps:$4 sm:$0xff]  }
  0x6f   :  { %v2507_v31 = vcombine.low %v121_v26, %v121_v26  ;;  %v2510_v33 = vcombine.high %v122_v30, %v122_v30  ;;  %v2512_v37 = vcombine.high %v123_v34, %v123_v34  ;;  %v2509_v38 = vcombine.low %v122_v30, %v122_v30  ;;  %v2876_v44 = vld [vmem:[#allocation9 + $0xc8] ss:$12 sps:$4 sm:$0xff]   ;;  %v2849_v45 = vld [vmem:[#allocation9] ss:$12 sps:$4 sm:$0xff]   ;;  %v2852_v47 = vld [vmem:[#allocation9 + $0x18] ss:$12 sps:$4 sm:$0xff]  }
  0x70   :  { %v134_v6 = vsub.s32 %v131_v5, %v3397_v4  ;;  %v381_v32 = vsel %vm379_vm2, %v2505_v29, 0  ;;  %v117_v39 = vpack.c.bf16 %v116_v35, %v116_v35  ;;  %v2511_v40 = vcombine.low %v123_v34, %v123_v34  ;;  %v2854_v46 = vld [vmem:[#allocation9 + $0x1c] ss:$12 sps:$4 sm:$0xff]   ;;  %v2857_v49 = vld [vmem:[#allocation9 + $0x34] ss:$12 sps:$4 sm:$0xff]  }
  0x71   :  { %v387_v36 = vsel %vm379_vm2, %v2507_v31, 0  ;;  %vm375_vm3 = vcmask 64512   ;;  %v393_v41 = vsel %vm379_vm2, %v2509_v38, 0  ;;  %v2877_v48 = vld [vmem:[#allocation9 + $0x8] ss:$12 sps:$4 sm:$0xff]   ;;  %vm2487_vm6 = vcmask 58368  }
  0x72   :  { %v135_v9 = vrot.slane %v124_v7, %v134_v6  ;;  %v152_v10 = vrot.slane %v125_v8, %v134_v6  ;;  %v142_v18 = vrot.slane %v128_v11, %v134_v6  ;;  %v159_v19 = vrot.slane %v145_v13, %v134_v6  ;;  %v2881_v50 = vld [vmem:[#allocation9 + $0xe0] ss:$12 sps:$4 sm:$0xff]   ;;  %v2855_v52 = vld [vmem:[#allocation9 + $0x30] ss:$12 sps:$4 sm:$0xff]   ;;  %v2886_v53 = vld [vmem:[#allocation9 + $0xf8] ss:$12 sps:$4 sm:$0xff]  }
  0x73   :  { %v399_v43 = vsel %vm379_vm2, %v2511_v40, 0  ;;  %v2882_v51 = vld [vmem:[#allocation9 + $0x20] ss:$12 sps:$4 sm:$0xff]   ;;  %v2887_v55 = vld [vmem:[#allocation9 + $0x38] ss:$12 sps:$4 sm:$0xff]  }
  0x74   :  { %v143_v14 = vcombine.high %v135_v9, %v135_v9  ;;  %v168_v15 = vsel %vm166_vm0, %v135_v9, 0  ;;  %v160_v16 = vcombine.high %v152_v10, %v152_v10  ;;  %v144_v21 = vcombine.high %v142_v18, %v142_v18  ;;  %v2860_v54 = vld [vmem:[#allocation9 + $0x4c] ss:$12 sps:$4 sm:$0xff]   ;;  %v2858_v56 = vld [vmem:[#allocation9 + $0x48] ss:$12 sps:$4 sm:$0xff]  }
  0x75   :  { %v174_v22 = vsel %vm166_vm0, %v142_v18, 0  ;;  %v180_v23 = vsel %vm166_vm0, %v152_v10, 0  ;;  %v161_v25 = vcombine.high %v159_v19, %v159_v19  ;;  %v186_v27 = vsel %vm166_vm0, %v159_v19, 0  ;;  %v2891_v57 = vld [vmem:[#allocation9 + $0x110] ss:$12 sps:$4 sm:$0xff]  }
  0x76   :  { %2497 = vmatprep.subr.msk.bf16.mxu0 %vm166_vm0, %v143_v14  ;;  %2499 = vmatprep.subr.msk.bf16.mxu1 %vm166_vm0, %v144_v21  ;;  %v2863_v58 = vld [vmem:[#allocation9 + $0x64] ss:$12 sps:$4 sm:$0xff]   ;;  %v2861_v60 = vld [vmem:[#allocation9 + $0x60] ss:$12 sps:$4 sm:$0xff]   ;;  %v2896_v61 = vld [vmem:[#allocation9 + $0x128] ss:$12 sps:$4 sm:$0xff]  }
  0x77   :  { %192 = vmatpush1.bf16.msra.mxu0 %v168_v15  ;;  %233 = vmatpush1.bf16.msra.mxu1 %v174_v22  ;;  %v2892_v59 = vld [vmem:[#allocation9 + $0x50] ss:$12 sps:$4 sm:$0xff]   ;;  %v2897_v63 = vld [vmem:[#allocation9 + $0x68] ss:$12 sps:$4 sm:$0xff]   ;;  %v2864_v1 = vld [vmem:[#allocation9 + $0x78] ss:$12 sps:$4 sm:$0xff]  }
  0x78   :  { %2501 = vmatprep.subr.msk.bf16.mxu0 %vm166_vm0, %v160_v16  ;;  %2503 = vmatprep.subr.msk.bf16.mxu1 %vm166_vm0, %v161_v25  ;;  %v2866_v62 = vld [vmem:[#allocation9 + $0x7c] ss:$12 sps:$4 sm:$0xff]   ;;  %v2901_v2 = vld [vmem:[#allocation9 + $0x140] ss:$12 sps:$4 sm:$0xff]   ;;  %v2875_v10 = vld [vmem:[#allocation9 + $0xc4] ss:$12 sps:$4 sm:$0xff]  }
  0x79   :  { %v2869_v5 = vld [vmem:[#allocation9 + $0x94] ss:$12 sps:$4 sm:$0xff]   ;;  %v2867_v7 = vld [vmem:[#allocation9 + $0x90] ss:$12 sps:$4 sm:$0xff]   ;;  %v2872_v8 = vld [vmem:[#allocation9 + $0xac] ss:$12 sps:$4 sm:$0xff]  }
  0x7a   :  { %2498 = vmatmul.mubr.msk.bf16.vlgmr.msra.gmra.mrb[0].mxu0 %vm162_vm1, %v119_v20  ;;  %2500 = vmatmul.mubr.msk.bf16.vlgmr.msra.gmra.mrb[0].mxu1 %vm162_vm1, %v119_v20  ;;  %v2902_v6 = vld [vmem:[#allocation9 + $0x80] ss:$12 sps:$4 sm:$0xff]   ;;  %v2870_v9 = vld [vmem:[#allocation9 + $0xa8] ss:$12 sps:$4 sm:$0xff]   ;;  %v2878_v13 = vld [vmem:[#allocation9 + $0xd8] ss:$12 sps:$4 sm:$0xff]  }
  0x7b   :  { %274 = vmatpush1.bf16.msra.mxu0 %v180_v23  ;;  %305 = vmatprep.mubr.bf16.mxu0 %v3255_v3  ;;  %v2873_v11 = vld [vmem:[#allocation9 + $0xc0] ss:$12 sps:$4 sm:$0xff]   ;;  %v2880_v12 = vld [vmem:[#allocation9 + $0xdc] ss:$12 sps:$4 sm:$0xff]   ;;  %v2895_v18 = vld [vmem:[#allocation9 + $0x124] ss:$12 sps:$4 sm:$0xff]  }
  0x7c   :  { %2513 = vmatprep.subr.msk.bf16.mxu0 %vm379_vm2, %v2506_v24  ;;  %315 = vmatpush1.bf16.msra.mxu1 %v186_v27  ;;  %v2885_v14 = vld [vmem:[#allocation9 + $0xf4] ss:$12 sps:$4 sm:$0xff]   ;;  %v2883_v15 = vld [vmem:[#allocation9 + $0xf0] ss:$12 sps:$4 sm:$0xff]   ;;  %v2890_v16 = vld [vmem:[#allocation9 + $0x10c] ss:$12 sps:$4 sm:$0xff]  }
  0x7d   :  { %346 = vmatprep.mubr.bf16.mxu1 %v3255_v3  ;;  %2515 = vmatprep.subr.msk.bf16.mxu1 %vm379_vm2, %v2508_v28  ;;  %v2888_v17 = vld [vmem:[#allocation9 + $0x108] ss:$12 sps:$4 sm:$0xff]   ;;  %v2893_v19 = vld [vmem:[#allocation9 + $0x120] ss:$12 sps:$4 sm:$0xff]   ;;  %v2898_v21 = vld [vmem:[#allocation9 + $0x138] ss:$12 sps:$4 sm:$0xff]  }
  0x7e   :  { %v2905_v22 = vld [vmem:[#allocation9 + $0x154] ss:$12 sps:$4 sm:$0xff]   ;;  %v2906_v23 = vld [vmem:[#allocation9 + $0x158] ss:$12 sps:$4 sm:$0xff]   ;;  %v2903_v24 = vld [vmem:[#allocation9 + $0x150] ss:$12 sps:$4 sm:$0xff]  }
  0x7f   :  { %v2907_v25 = vld [vmem:[#allocation9 + $0x98] ss:$12 sps:$4 sm:$0xff]   ;;  %v2911_v27 = vld [vmem:[#allocation9 + $0x170] ss:$12 sps:$4 sm:$0xff]   ;;  %v2908_v28 = vld [vmem:[#allocation9 + $0x168] ss:$12 sps:$4 sm:$0xff]  }
  0x80   :  { %v2910_v26 = vld [vmem:[#allocation9 + $0x16c] ss:$12 sps:$4 sm:$0xff]   ;;  %v2912_v29 = vld [vmem:[#allocation9 + $0xb0] ss:$12 sps:$4 sm:$0xff]   ;;  %v2917_v31 = vld [vmem:[#allocation9 + $0x248] ss:$12 sps:$4 sm:$0xff]  }
  0x81   :  { %v2916_v30 = vld [vmem:[#allocation9 + $0x184] ss:$12 sps:$4 sm:$0xff]  }
  0x82   :  { %2502 = vmatmul.mubr.msk.bf16.vlgmr.msra.gmra.mrb[4].mxu0 %vm162_vm1, %v119_v20  ;;  %2504 = vmatmul.mubr.msk.bf16.vlgmr.msra.gmra.mrb[4].mxu1 %vm162_vm1, %v119_v20  ;;  %v2900_v20 = vld [vmem:[#allocation9 + $0x13c] ss:$12 sps:$4 sm:$0xff]  }
  0x83   :  { %405 = vmatpush1.bf16.msra.mxu0 %v381_v32  ;;  %436 = vmatprep.mubr.bf16.mxu0 %v3255_v3  ;;  %v3256_v32 = vmov 1966171168  }
  0x84   :  { %2517 = vmatprep.subr.msk.bf16.mxu0 %vm379_vm2, %v2510_v33  ;;  %446 = vmatpush1.bf16.msra.mxu1 %v387_v36  ;;  %v580_v33 = vunpack.c.l.s4 %v3256_v32  ;;  %v576_v36 = vld [vmem:[%s3553_s4] sm:$0xff] }
  0x85   :  { %477 = vmatprep.mubr.bf16.mxu1 %v3255_v3  ;;  %2519 = vmatprep.subr.msk.bf16.mxu1 %vm379_vm2, %v2512_v37  ;;  %v578_v40 = vcombine.high %v576_v36, %v576_v36  ;;  %v2928_v32 = vld [vmem:[#allocation9 + $0x1b8] ss:$12 sps:$4 sm:$0xff]  }
  0x86   :  { %v581_v34 = vunpack.c.0.s8 %v580_v33 }
  0x88   :  { %v3431_v35 = vsub.s32 %v581_v34, %v3397_v4 }
  0x8a   :  { %2514 = vmatmul.mubr.msk.bf16.vlgmr.msra.gmra.mrb[0].mxu0 %vm375_vm3, %v117_v39  ;;  %2516 = vmatmul.mubr.msk.bf16.vlgmr.msra.gmra.mrb[0].mxu1 %vm375_vm3, %v117_v39  ;;  %v585_v37 = vrot.slane %v576_v36, %v3431_v35  ;;  %v2931_v36 = vld [vmem:[#allocation9 + $0x1cc] ss:$12 sps:$4 sm:$0xff]  }
  0x8b   :  { %487 = vmatpush1.bf16.msra.mxu0 %v393_v41  ;;  %518 = vmatprep.mubr.bf16.mxu0 %v3255_v3 }
  0x8c   :  { %1339 = vmatprep.subr.bf16.mxu0 %v2851_v42  ;;  %528 = vmatpush1.bf16.msra.mxu1 %v399_v43  ;;  %v593_v38 = vcombine.high %v585_v37, %v585_v37  ;;  %v3442_v42 = vsub.s32 0, %v3397_v4 }
  0x8d   :  { %559 = vmatprep.mubr.bf16.mxu1 %v3255_v3  ;;  %2716 = vmatprep.subr.bf16.mxu1 %v2876_v44  ;;  %v3447_v44 = vrot.slane %v578_v40, %v3431_v35  ;;  %v2933_v40 = vld [vmem:[#allocation9 + $0x1d0] ss:$12 sps:$4 sm:$0xff]  }
  0x8e   :  { %v615_v41 = vrot.slane %v593_v38, %v3431_v35  ;;  %v2929_v38 = vld [vmem:[#allocation9 + $0x1c8] ss:$12 sps:$4 sm:$0xff]  }
  0x92   :  { %2518 = vmatmul.mubr.msk.bf16.vlgmr.msra.gmra.mrb[4].mxu0 %vm375_vm3, %v117_v39  ;;  %2520 = vmatmul.mubr.msk.bf16.vlgmr.msra.gmra.mrb[4].mxu1 %vm375_vm3, %v117_v39  ;;  %v3438_v39 = vrot.slane %v585_v37, %v3431_v35  ;;  %v2932_v37 = vld [vmem:[#allocation9 + $0x290] ss:$12 sps:$4 sm:$0xff]  }
  0x93   :  { %1340 = vmatpush1.bf16.msra.mxu0 %v2849_v45  ;;  %2717 = vmatpush3.bf16.msra.mxu1 %v2877_v48  ;;  %v625_v45 = vcombine.high %v615_v41, %v615_v41  ;;  %v608_v48 = vrot.slane %v3447_v44, %v3431_v35 }
  0x94   :  { %1341 = vmatprep.subr.bf16.mxu0 %v2854_v46  ;;  %2718 = vmatprep.subr.bf16.mxu1 %v2881_v50  ;;  %v628_v43 = vpack.i.b16 %v3438_v39, %v3438_v39  ;;  %v635_v46 = vpack.i.b16 %v615_v41, %v615_v41  ;;  %v2936_v41 = vld [vmem:[#allocation9 + $0x1e4] ss:$12 sps:$4 sm:$0xff]  }
  0x97   :  { %1342 = vmatpush1.bf16.msra.mxu0 %v2852_v47  ;;  %2719 = vmatpush3.bf16.msra.mxu1 %v2882_v51  ;;  %v633_v47 = vrot.slane %v628_v43, %v3442_v42  ;;  %v640_v51 = vrot.slane %v635_v46, %v3442_v42  ;;  %v2937_v43 = vld [vmem:[#allocation9 + $0x2a8] ss:$12 sps:$4 sm:$0xff]   ;;  %v2934_v46 = vld [vmem:[#allocation9 + $0x1e0] ss:$12 sps:$4 sm:$0xff]  }
  0x98   :  { %1343 = vmatprep.subr.bf16.mxu0 %v2857_v49  ;;  %2720 = vmatprep.subr.bf16.mxu1 %v2886_v53  ;;  %v649_v49 = vpack.i.b16 %v625_v45, %v625_v45  ;;  %v594_v45 = vcombine.high %v3447_v44, %v3447_v44  ;;  %v2946_v44 = vld [vmem:[#allocation9 + $0x214] ss:$12 sps:$4 sm:$0xff]  }
  0x9b   :  { %1344 = vmatpush1.bf16.msra.mxu0 %v2855_v52  ;;  %2721 = vmatpush3.bf16.msra.mxu1 %v2887_v55 }
  0x9c   :  { %1345 = vmatprep.subr.bf16.mxu0 %v2860_v54  ;;  %2722 = vmatprep.subr.bf16.mxu1 %v2891_v57 }
  0x9f   :  { %1346 = vmatpush1.bf16.msra.mxu0 %v2858_v56  ;;  %2723 = vmatpush3.bf16.msra.mxu1 %v2892_v59  ;;  %v624_v56 = vcombine.high %v608_v48, %v608_v48  ;;  %v656_v59 = vpack.i.b16 %v608_v48, %v608_v48  ;;  %v623_v48 = vcombine.high %v3438_v39, %v3438_v39  ;;  %v2944_v39 = vld [vmem:[#allocation9 + $0x210] ss:$12 sps:$4 sm:$0xff]  }
  0xa0   :  { %1347 = vmatprep.subr.bf16.mxu0 %v2863_v58  ;;  %2724 = vmatprep.subr.bf16.mxu1 %v2896_v61  ;;  %v654_v61 = vrot.slane %v649_v49, %v3442_v42  ;;  %v2941_v49 = vld [vmem:[#allocation9 + $0x1fc] ss:$12 sps:$4 sm:$0xff]  }
  0xa3   :  { %1348 = vmatpush1.bf16.msra.mxu0 %v2861_v60  ;;  %2725 = vmatpush3.bf16.msra.mxu1 %v2897_v63 }
  0xa4   :  { %1349 = vmatprep.subr.bf16.mxu0 %v2866_v62  ;;  %2726 = vmatprep.subr.bf16.mxu1 %v2901_v2 }
  0xa7   :  { %1350 = vmatpush1.bf16.msra.mxu0 %v2864_v1  ;;  %2727 = vmatpush3.bf16.msra.mxu1 %v2902_v6  ;;  %v2914_v6 = vld [vmem:[#allocation9 + $0x180] ss:$12 sps:$4 sm:$0xff]  }
  0xa8   :  { %1351 = vmatprep.subr.bf16.mxu0 %v2869_v5  ;;  %2728 = vmatprep.subr.bf16.mxu1 %v2906_v23 }
  0xab   :  { %1352 = vmatpush1.bf16.msra.mxu0 %v2867_v7  ;;  %2729 = vmatpush3.bf16.msra.mxu1 %v2907_v25  ;;  %v2918_v7 = vld [vmem:[#allocation9 + $0x188] ss:$12 sps:$4 sm:$0xff]  }
  0xac   :  { %1353 = vmatprep.subr.bf16.mxu0 %v2872_v8  ;;  %2730 = vmatprep.subr.bf16.mxu1 %v2911_v27  ;;  %v2926_v25 = vld [vmem:[#allocation9 + $0x1b4] ss:$12 sps:$4 sm:$0xff]  }
  0xaf   :  { %1354 = vmatpush1.bf16.msra.mxu0 %v2870_v9  ;;  %2731 = vmatpush3.bf16.msra.mxu1 %v2912_v29  ;;  %v670_v9 = vpack.i.b16 %v624_v56, %v624_v56 }
  0xb0   :  { %1355 = vmatprep.subr.bf16.mxu0 %v2875_v10  ;;  %2738 = vmatprep.subr.bf16.mxu1 %v2917_v31  ;;  %v2924_v31 = vld [vmem:[#allocation9 + $0x1b0] ss:$12 sps:$4 sm:$0xff]  }
  0xb3   :  { %1356 = vmatpush1.bf16.msra.mxu0 %v2873_v11  ;;  %v661_v11 = vrot.slane %v656_v59, %v3442_v42 }
  0xb4   :  { %1357 = vmatprep.subr.bf16.mxu0 %v2880_v12  ;;  %v2921_v12 = vld [vmem:[#allocation9 + $0x19c] ss:$12 sps:$4 sm:$0xff]  }
  0xb7   :  { %1358 = vmatpush1.bf16.msra.mxu0 %v2878_v13  ;;  %v2922_v13 = vld [vmem:[#allocation9 + $0x260] ss:$12 sps:$4 sm:$0xff]  }
  0xb8   :  { %1359 = vmatprep.subr.bf16.mxu0 %v2885_v14 }
  0xbb   :  { %1360 = vmatpush1.bf16.msra.mxu0 %v2883_v15 }
  0xbc   :  { %1361 = vmatprep.subr.bf16.mxu0 %v2890_v16 }
  0xbf   :  { %1362 = vmatpush1.bf16.msra.mxu0 %v2888_v17 }
  0xc0   :  { %1363 = vmatprep.subr.bf16.mxu0 %v2895_v18 }
  0xc3   :  { %1364 = vmatpush1.bf16.msra.mxu0 %v2893_v19 }
  0xc4   :  { %1365 = vmatprep.subr.bf16.mxu0 %v2900_v20  ;;  %v2919_v20 = vld [vmem:[#allocation9 + $0x198] ss:$12 sps:$4 sm:$0xff]  }
  0xc7   :  { %1366 = vmatpush1.bf16.msra.mxu0 %v2898_v21  ;;  %v2923_v21 = vld [vmem:[#allocation9 + $0x1a0] ss:$12 sps:$4 sm:$0xff]  }
  0xc8   :  { %1367 = vmatprep.subr.bf16.mxu0 %v2905_v22  ;;  %v675_v22 = vrot.slane %v670_v9, %v3442_v42  ;;  %v2954_v9 = vld [vmem:[#allocation9 + $0x240] ss:$12 sps:$4 sm:$0xff]  }
  0xcb   :  { %1368 = vmatpush1.bf16.msra.mxu0 %v2903_v24 }
  0xcc   :  { %1369 = vmatprep.subr.bf16.mxu0 %v2910_v26  ;;  %v2927_v26 = vld [vmem:[#allocation9 + $0x278] ss:$12 sps:$4 sm:$0xff]  }
  0xcf   :  { %1370 = vmatpush1.bf16.msra.mxu0 %v2908_v28 }
  0xd0   :  { %1380 = vmatprep.subr.bf16.mxu0 %v2916_v30 }
 0x15d   :  { %v438_v50 = vpop.f32.mrb[0].mxu0  ;;  %v3453_v60 = vpop.f32.mrb[0].mxu1 }
 0x15e   :  { %v568_v52 = vpack.c.bf16 %v438_v50, %v438_v50  ;;  %v440_v53 = vpop.f32.mrb[1].mxu0  ;;  %v481_v63 = vpop.f32.mrb[1].mxu1  ;;  %v2942_v50 = vld [vmem:[#allocation9 + $0x2c0] ss:$12 sps:$4 sm:$0xff]  }
 0x15f   :  { %v569_v54 = vpack.c.bf16 %v440_v53, %v440_v53  ;;  %v442_v55 = vpop.f32.mrb[2].mxu0  ;;  %v571_v1 = vpack.c.bf16 %v481_v63, %v481_v63  ;;  %v483_v2 = vpop.f32.mrb[2].mxu1  ;;  %v2943_v53 = vld [vmem:[#allocation9 + $0x200] ss:$12 sps:$4 sm:$0xff]  }
 0x160   :  { %v683_v57 = vadd.bf16 %v633_v47, %v568_v52  ;;  %v443_v58 = vpop.f32.mrb[3].mxu0  ;;  %v484_v8 = vpop.f32.mrb[3].mxu1  ;;  %v2938_v47 = vld [vmem:[#allocation9 + $0x1e8] ss:$12 sps:$4 sm:$0xff]   ;;  %v2939_v52 = vld [vmem:[#allocation9 + $0x1f8] ss:$12 sps:$4 sm:$0xff]  }
 0x161   :  { %v684_v62 = vadd.bf16 %v640_v51, %v569_v54  ;;  %v686_v14 = vadd.bf16 %v654_v61, %v571_v1  ;;  %v3474_v51 = vrot.slane %v594_v45, %v3431_v35  ;;  %v642_v54 = vpack.i.b16 %v623_v48, %v623_v48  ;;  %v2947_v55 = vld [vmem:[#allocation9 + $0x2d8] ss:$12 sps:$4 sm:$0xff]   ;;  %v2949_v2 = vld [vmem:[#allocation9 + $0x228] ss:$12 sps:$4 sm:$0xff]  }
 0x162   :  { %v691_v10 = vmax.bf16 %v3255_v3, %v683_v57  ;;  %v2948_v57 = vld [vmem:[#allocation9 + $0x218] ss:$12 sps:$4 sm:$0xff]   ;;  %v570_v58 = vpack.c.bf16 %v3453_v60, %v3453_v60 }
 0x163   :  { %v692_v5 = vmax.bf16 %v3255_v3, %v684_v62  ;;  %v694_v18 = vmax.bf16 %v3255_v3, %v686_v14  ;;  %v663_v56 = vpack.i.b16 %v3474_v51, %v3474_v51  ;;  %v647_v59 = vrot.slane %v642_v54, %v3442_v42  ;;  %v2951_v61 = vld [vmem:[#allocation9 + $0x22c] ss:$12 sps:$4 sm:$0xff]   ;;  %v2952_v62 = vld [vmem:[#allocation9 + $0x2f0] ss:$12 sps:$4 sm:$0xff]  }
 0x164   :  { %v2959_v60 = vld [vmem:[#allocation10 + $0x4] ss:$12 sps:$4 sm:$0xff]   ;;  %v3001_v45 = vld [vmem:[#allocation10 + $0xac] ss:$12 sps:$4 sm:$0xff]  }
 0x165   :  { %v520_v15 = vpop.f32.mrb[4].mxu0  ;;  %1371 = vmatprep.mubr.bf16.mxu0 %v692_v5  ;;  %1453 = vmatprep.mubr.bf16.mxu1 %v692_v5  ;;  %v561_v27 = vpop.f32.mrb[4].mxu1  ;;  %v668_v1 = vrot.slane %v663_v56, %v3442_v42  ;;  %v2953_v5 = vld [vmem:[#allocation9 + $0x230] ss:$12 sps:$4 sm:$0xff]   ;;  %v3010_v54 = vld [vmem:[#allocation10 + $0xe0] ss:$12 sps:$4 sm:$0xff]  }
 0x166   :  { %v572_v16 = vpack.c.bf16 %v520_v15, %v520_v15  ;;  %v3459_v17 = vpop.f32.mrb[5].mxu0  ;;  %1372 = vmatmul.mubr.bf16.vlgmr.msra.gmra.mrb[8].mxu0 %v691_v10  ;;  %1454 = vmatmul.mubr.bf16.vlgmr.msra.gmra.mrb[8].mxu1 %v691_v10  ;;  %v574_v28 = vpack.c.bf16 %v561_v27, %v561_v27  ;;  %v3465_v29 = vpop.f32.mrb[5].mxu1  ;;  %v2957_v10 = vld [vmem:[#allocation10] ss:$12 sps:$4 sm:$0xff]   ;;  %v2960_v15 = vld [vmem:[#allocation9 + $0x258] ss:$12 sps:$4 sm:$0xff]  }
 0x167   :  { %1381 = vmatpush1.bf16.msra.mxu0 %v2914_v6  ;;  %2739 = vmatpush3.bf16.msra.mxu1 %v2918_v7  ;;  %v524_v19 = vpop.f32.mrb[6].mxu0  ;;  %v565_v30 = vpop.f32.mrb[6].mxu1  ;;  %v573_v63 = vpack.c.bf16 %v3459_v17, %v3459_v17  ;;  %v685_v6 = vadd.bf16 %v647_v59, %v570_v58  ;;  %v2956_v7 = vld [vmem:[#allocation9 + $0x244] ss:$12 sps:$4 sm:$0xff]   ;;  %v2968_v17 = vld [vmem:[#allocation9 + $0x274] ss:$12 sps:$4 sm:$0xff]  }
 0x168   :  { %v3463_v23 = vadd.bf16 %v661_v11, %v572_v16  ;;  %v525_v24 = vpop.f32.mrb[7].mxu0  ;;  %1382 = vmatprep.subr.bf16.mxu0 %v2921_v12  ;;  %2740 = vmatprep.subr.bf16.mxu1 %v2922_v13  ;;  %v3467_v33 = vadd.bf16 %v675_v22, %v574_v28  ;;  %v566_v34 = vpop.f32.mrb[7].mxu1  ;;  %v2962_v12 = vld [vmem:[#allocation9 + $0x25c] ss:$12 sps:$4 sm:$0xff]   ;;  %v2963_v16 = vld [vmem:[#allocation10 + $0x18] ss:$12 sps:$4 sm:$0xff]  }
 0x169   :  { %1412 = vmatprep.mubr.bf16.mxu0 %v694_v18  ;;  %1493 = vmatprep.mubr.bf16.mxu1 %v694_v18  ;;  %v688_v8 = vadd.bf16 %v668_v1, %v573_v63  ;;  %v3485_v11 = vmax.bf16 %v3255_v3, %v685_v6  ;;  %v2965_v13 = vld [vmem:[#allocation10 + $0x1c] ss:$12 sps:$4 sm:$0xff]   ;;  %v2971_v18 = vld [vmem:[#allocation10 + $0x34] ss:$12 sps:$4 sm:$0xff]   ;;  %v2977_v22 = vld [vmem:[#allocation10 + $0x4c] ss:$12 sps:$4 sm:$0xff]  }
 0x16a   :  { %v2966_v19 = vld [vmem:[#allocation9 + $0x270] ss:$12 sps:$4 sm:$0xff]   ;;  %v2972_v24 = vld [vmem:[#allocation9 + $0x288] ss:$12 sps:$4 sm:$0xff]   ;;  %v2978_v28 = vld [vmem:[#allocation9 + $0x2a0] ss:$12 sps:$4 sm:$0xff]  }
 0x16b   :  { %1383 = vmatpush1.bf16.msra.mxu0 %v2919_v20  ;;  %2741 = vmatpush3.bf16.msra.mxu1 %v2923_v21  ;;  %v3489_v14 = vmax.bf16 %v3255_v3, %v688_v8  ;;  %v2969_v20 = vld [vmem:[#allocation10 + $0x30] ss:$12 sps:$4 sm:$0xff]   ;;  %v2974_v21 = vld [vmem:[#allocation9 + $0x28c] ss:$12 sps:$4 sm:$0xff]   ;;  %v3014_v56 = vld [vmem:[#allocation10 + $0xf4] ss:$12 sps:$4 sm:$0xff]   ;;  %v626_v8 = vcombine.high %v3474_v51, %v3474_v51  ;;  %v575_v51 = vpack.c.bf16 %v3465_v29, %v3465_v29 }
 0x16c   :  { %1384 = vmatprep.subr.bf16.mxu0 %v2926_v25  ;;  %2742 = vmatprep.subr.bf16.mxu1 %v2927_v26  ;;  %v2975_v25 = vld [vmem:[#allocation10 + $0x48] ss:$12 sps:$4 sm:$0xff]   ;;  %v2980_v26 = vld [vmem:[#allocation9 + $0x2a4] ss:$12 sps:$4 sm:$0xff]   ;;  %v2981_v30 = vld [vmem:[#allocation10 + $0x60] ss:$12 sps:$4 sm:$0xff]  }
 0x16d   :  { %v2983_v27 = vld [vmem:[#allocation10 + $0x64] ss:$12 sps:$4 sm:$0xff]   ;;  %v3019_v59 = vld [vmem:[#allocation10 + $0x10c] ss:$12 sps:$4 sm:$0xff]   ;;  %v3026_v6 = vld [vmem:[#allocation10 + $0x68] ss:$12 sps:$4 sm:$0xff]  }
 0x16e   :  { %v2984_v34 = vld [vmem:[#allocation9 + $0x2b8] ss:$12 sps:$4 sm:$0xff]   ;;  %v3021_v63 = vld [vmem:[#allocation10 + $0x50] ss:$12 sps:$4 sm:$0xff]   ;;  %v3046_v29 = vld [vmem:[#allocation10 + $0x188] ss:$12 sps:$4 sm:$0xff]  }
 0x16f   :  { %1385 = vmatpush1.bf16.msra.mxu0 %v2924_v31  ;;  %2743 = vmatpush3.bf16.msra.mxu1 %v2928_v32  ;;  %v2986_v31 = vld [vmem:[#allocation9 + $0x2bc] ss:$12 sps:$4 sm:$0xff]   ;;  %v3004_v48 = vld [vmem:[#allocation10 + $0xc4] ss:$12 sps:$4 sm:$0xff]  }
 0x170   :  { %1386 = vmatprep.subr.bf16.mxu0 %v2931_v36  ;;  %2744 = vmatprep.subr.bf16.mxu1 %v2932_v37  ;;  %v2989_v32 = vld [vmem:[#allocation10 + $0x7c] ss:$12 sps:$4 sm:$0xff]   ;;  %v2987_v36 = vld [vmem:[#allocation10 + $0x78] ss:$12 sps:$4 sm:$0xff]   ;;  %v2992_v37 = vld [vmem:[#allocation9 + $0x2d4] ss:$12 sps:$4 sm:$0xff]  }
 0x171   :  { %v3016_v58 = vld [vmem:[#allocation10 + $0x38] ss:$12 sps:$4 sm:$0xff]  }
 0x172   :  { %v3024_v1 = vld [vmem:[#allocation10 + $0x124] ss:$12 sps:$4 sm:$0xff]  }
 0x173   :  { %1387 = vmatpush1.bf16.msra.mxu0 %v2929_v38  ;;  %2745 = vmatpush3.bf16.msra.mxu1 %v2933_v40  ;;  %v2995_v38 = vld [vmem:[#allocation10 + $0x94] ss:$12 sps:$4 sm:$0xff]   ;;  %v2990_v40 = vld [vmem:[#allocation9 + $0x2d0] ss:$12 sps:$4 sm:$0xff]  }
 0x174   :  { %1388 = vmatprep.subr.bf16.mxu0 %v2936_v41  ;;  %2746 = vmatprep.subr.bf16.mxu1 %v2937_v43  ;;  %v2993_v41 = vld [vmem:[#allocation10 + $0x90] ss:$12 sps:$4 sm:$0xff]   ;;  %v2998_v43 = vld [vmem:[#allocation9 + $0x2ec] ss:$12 sps:$4 sm:$0xff]  }
 0x177   :  { %1389 = vmatpush1.bf16.msra.mxu0 %v2934_v46  ;;  %2747 = vmatpush3.bf16.msra.mxu1 %v2938_v47  ;;  %v2996_v46 = vld [vmem:[#allocation9 + $0x2e8] ss:$12 sps:$4 sm:$0xff]  }
 0x178   :  { %1390 = vmatprep.subr.bf16.mxu0 %v2941_v49  ;;  %2748 = vmatprep.subr.bf16.mxu1 %v2942_v50  ;;  %v2999_v47 = vld [vmem:[#allocation10 + $0xa8] ss:$12 sps:$4 sm:$0xff]   ;;  %v3002_v50 = vld [vmem:[#allocation10 + $0xc0] ss:$12 sps:$4 sm:$0xff]  }
 0x179   :  { %v3005_v49 = vld [vmem:[#allocation10 + $0xc8] ss:$12 sps:$4 sm:$0xff]  }
 0x17b   :  { %1391 = vmatpush1.bf16.msra.mxu0 %v2939_v52  ;;  %2749 = vmatpush3.bf16.msra.mxu1 %v2943_v53  ;;  %v3006_v52 = vld [vmem:[#allocation10 + $0x8] ss:$12 sps:$4 sm:$0xff]  }
 0x17c   :  { %1392 = vmatprep.subr.bf16.mxu0 %v2946_v44  ;;  %2750 = vmatprep.subr.bf16.mxu1 %v2947_v55  ;;  %v3009_v53 = vld [vmem:[#allocation10 + $0xdc] ss:$12 sps:$4 sm:$0xff]   ;;  %v3007_v44 = vld [vmem:[#allocation10 + $0xd8] ss:$12 sps:$4 sm:$0xff]   ;;  %v3011_v55 = vld [vmem:[#allocation10 + $0x20] ss:$12 sps:$4 sm:$0xff]  }
 0x17f   :  { %1393 = vmatpush1.bf16.msra.mxu0 %v2944_v39  ;;  %2751 = vmatpush3.bf16.msra.mxu1 %v2948_v57  ;;  %v3015_v39 = vld [vmem:[#allocation10 + $0xf8] ss:$12 sps:$4 sm:$0xff]   ;;  %v3012_v57 = vld [vmem:[#allocation10 + $0xf0] ss:$12 sps:$4 sm:$0xff]  }
 0x180   :  { %1394 = vmatprep.subr.bf16.mxu0 %v2951_v61  ;;  %2752 = vmatprep.subr.bf16.mxu1 %v2952_v62  ;;  %v3020_v61 = vld [vmem:[#allocation10 + $0x110] ss:$12 sps:$4 sm:$0xff]   ;;  %v3017_v62 = vld [vmem:[#allocation10 + $0x108] ss:$12 sps:$4 sm:$0xff]  }
 0x183   :  { %1395 = vmatpush1.bf16.msra.mxu0 %v2949_v2  ;;  %2753 = vmatpush3.bf16.msra.mxu1 %v2953_v5  ;;  %v3025_v2 = vld [vmem:[#allocation10 + $0x128] ss:$12 sps:$4 sm:$0xff]   ;;  %v3022_v5 = vld [vmem:[#allocation10 + $0x120] ss:$12 sps:$4 sm:$0xff]  }
 0x184   :  { %1396 = vmatprep.subr.bf16.mxu0 %v2956_v7  ;;  %2196 = vmatprep.subr.bf16.mxu1 %v2959_v60  ;;  %v3029_v7 = vld [vmem:[#allocation10 + $0x13c] ss:$12 sps:$4 sm:$0xff]   ;;  %v3030_v60 = vld [vmem:[#allocation10 + $0x140] ss:$12 sps:$4 sm:$0xff]  }
 0x186   :  { %1494 = vmatmul.mubr.bf16.vlgmr.msra.gmra.mrb[12].mxu1 %v3485_v11 }
 0x187   :  { %1397 = vmatpush1.bf16.msra.mxu0 %v2954_v9  ;;  %2197 = vmatpush1.bf16.msra.mxu1 %v2957_v10  ;;  %v3027_v9 = vld [vmem:[#allocation10 + $0x138] ss:$12 sps:$4 sm:$0xff]   ;;  %v3031_v10 = vld [vmem:[#allocation10 + $0x80] ss:$12 sps:$4 sm:$0xff]  }
 0x188   :  { %2228 = vmatprep.mubr.bf16.mxu1 %v3489_v14  ;;  %1398 = vmatprep.subr.bf16.mxu0 %v2962_v12  ;;  %v3035_v12 = vld [vmem:[#allocation10 + $0x158] ss:$12 sps:$4 sm:$0xff]  }
 0x189   :  { %2198 = vmatprep.subr.bf16.mxu1 %v2965_v13  ;;  %v677_v13 = vpack.i.b16 %v626_v8, %v626_v8  ;;  %v3096_v8 = vld [vmem:[#allocation10 + $0x2a4] ss:$12 sps:$4 sm:$0xff]  }
 0x18b   :  { %1399 = vmatpush1.bf16.msra.mxu0 %v2960_v15  ;;  %2199 = vmatpush1.bf16.msra.mxu1 %v2963_v16  ;;  %v3036_v15 = vld [vmem:[#allocation10 + $0x98] ss:$12 sps:$4 sm:$0xff]  }
 0x18c   :  { %1400 = vmatprep.subr.bf16.mxu0 %v2968_v17  ;;  %2200 = vmatprep.subr.bf16.mxu1 %v2971_v18  ;;  %v3039_v16 = vld [vmem:[#allocation10 + $0x16c] ss:$12 sps:$4 sm:$0xff]   ;;  %v3040_v17 = vld [vmem:[#allocation10 + $0x170] ss:$12 sps:$4 sm:$0xff]   ;;  %v682_v18 = vrot.slane %v677_v13, %v3442_v42 }
 0x18d   :  { %v3105_v13 = vld [vmem:[#allocation10 + $0x2ec] ss:$12 sps:$4 sm:$0xff]  }
 0x18f   :  { %1401 = vmatpush1.bf16.msra.mxu0 %v2966_v19  ;;  %2201 = vmatpush1.bf16.msra.mxu1 %v2969_v20  ;;  %v3037_v19 = vld [vmem:[#allocation10 + $0x168] ss:$12 sps:$4 sm:$0xff]   ;;  %v3041_v20 = vld [vmem:[#allocation10 + $0xb0] ss:$12 sps:$4 sm:$0xff]  }
 0x190   :  { %1402 = vmatprep.subr.bf16.mxu0 %v2974_v21  ;;  %2202 = vmatprep.subr.bf16.mxu1 %v2977_v22  ;;  %v3044_v21 = vld [vmem:[#allocation10 + $0x184] ss:$12 sps:$4 sm:$0xff]   ;;  %v3045_v22 = vld [vmem:[#allocation10 + $0x248] ss:$12 sps:$4 sm:$0xff]  }
 0x193   :  { %1403 = vmatpush1.bf16.msra.mxu0 %v2972_v24  ;;  %2203 = vmatpush1.bf16.msra.mxu1 %v2975_v25  ;;  %v690_v24 = vadd.bf16 %v682_v18, %v575_v51  ;;  %v3042_v25 = vld [vmem:[#allocation10 + $0x180] ss:$12 sps:$4 sm:$0xff]  }
 0x194   :  { %1404 = vmatprep.subr.bf16.mxu0 %v2980_v26  ;;  %2204 = vmatprep.subr.bf16.mxu1 %v2983_v27  ;;  %v695_v26 = vmax.bf16 %v3255_v3, %v3463_v23  ;;  %v3052_v23 = vld [vmem:[#allocation10 + $0x1b0] ss:$12 sps:$4 sm:$0xff]  }
 0x195   :  { %v698_v27 = vmax.bf16 %v3255_v3, %v690_v24 }
 0x197   :  { %1405 = vmatpush1.bf16.msra.mxu0 %v2978_v28  ;;  %2205 = vmatpush1.bf16.msra.mxu1 %v2981_v30  ;;  %v3049_v28 = vld [vmem:[#allocation10 + $0x19c] ss:$12 sps:$4 sm:$0xff]   ;;  %v3050_v30 = vld [vmem:[#allocation10 + $0x260] ss:$12 sps:$4 sm:$0xff]  }
 0x198   :  { %1406 = vmatprep.subr.bf16.mxu0 %v2986_v31  ;;  %2206 = vmatprep.subr.bf16.mxu1 %v2989_v32  ;;  %v3047_v31 = vld [vmem:[#allocation10 + $0x198] ss:$12 sps:$4 sm:$0xff]   ;;  %v3051_v32 = vld [vmem:[#allocation10 + $0x1a0] ss:$12 sps:$4 sm:$0xff]  }
 0x19b   :  { %1407 = vmatpush1.bf16.msra.mxu0 %v2984_v34  ;;  %2207 = vmatpush1.bf16.msra.mxu1 %v2987_v36  ;;  %v3054_v34 = vld [vmem:[#allocation10 + $0x1b4] ss:$12 sps:$4 sm:$0xff]   ;;  %v3055_v36 = vld [vmem:[#allocation10 + $0x278] ss:$12 sps:$4 sm:$0xff]  }
 0x19c   :  { %1408 = vmatprep.subr.bf16.mxu0 %v2992_v37  ;;  %2208 = vmatprep.subr.bf16.mxu1 %v2995_v38  ;;  %v3056_v37 = vld [vmem:[#allocation10 + $0x1b8] ss:$12 sps:$4 sm:$0xff]  }
 0x19d   :  { %v3059_v38 = vld [vmem:[#allocation10 + $0x1cc] ss:$12 sps:$4 sm:$0xff]  }
 0x19f   :  { %1409 = vmatpush1.bf16.msra.mxu0 %v2990_v40  ;;  %2209 = vmatpush1.bf16.msra.mxu1 %v2993_v41  ;;  %v3060_v40 = vld [vmem:[#allocation10 + $0x290] ss:$12 sps:$4 sm:$0xff]   ;;  %v3057_v41 = vld [vmem:[#allocation10 + $0x1c8] ss:$12 sps:$4 sm:$0xff]  }
 0x1a0   :  { %1410 = vmatprep.subr.bf16.mxu0 %v2998_v43  ;;  %2210 = vmatprep.subr.bf16.mxu1 %v3001_v45  ;;  %v3061_v43 = vld [vmem:[#allocation10 + $0x1d0] ss:$12 sps:$4 sm:$0xff]  }
 0x1a1   :  { %v3064_v45 = vld [vmem:[#allocation10 + $0x1e4] ss:$12 sps:$4 sm:$0xff]  }
 0x1a3   :  { %1411 = vmatpush1.bf16.msra.mxu0 %v2996_v46  ;;  %2211 = vmatpush1.bf16.msra.mxu1 %v2999_v47  ;;  %v3065_v46 = vld [vmem:[#allocation10 + $0x2a8] ss:$12 sps:$4 sm:$0xff]   ;;  %v3062_v47 = vld [vmem:[#allocation10 + $0x1e0] ss:$12 sps:$4 sm:$0xff]  }
 0x1a4   :  { %2212 = vmatprep.subr.bf16.mxu1 %v3004_v48  ;;  %2760 = vmatprep.subr.bf16.mxu0 %v3005_v49  ;;  %v3066_v48 = vld [vmem:[#allocation10 + $0x1e8] ss:$12 sps:$4 sm:$0xff]  }
 0x1a5   :  { %v3069_v49 = vld [vmem:[#allocation10 + $0x1fc] ss:$12 sps:$4 sm:$0xff]  }
 0x1a6   :  { %1413 = vmatmul.mubr.bf16.vlgmr.msra.gmra.mrb[8].mxu0 %v3485_v11  ;;  %v3034_v11 = vld [vmem:[#allocation10 + $0x154] ss:$12 sps:$4 sm:$0xff]  }
 0x1a7   :  { %2213 = vmatpush1.bf16.msra.mxu1 %v3002_v50  ;;  %2761 = vmatpush3.bf16.msra.mxu0 %v3006_v52  ;;  %v3070_v50 = vld [vmem:[#allocation10 + $0x2c0] ss:$12 sps:$4 sm:$0xff]   ;;  %v3067_v52 = vld [vmem:[#allocation10 + $0x1f8] ss:$12 sps:$4 sm:$0xff]  }
 0x1a8   :  { %2310 = vmatprep.mubr.bf16.mxu0 %v3489_v14  ;;  %2214 = vmatprep.subr.bf16.mxu1 %v3009_v53  ;;  %v3032_v14 = vld [vmem:[#allocation10 + $0x150] ss:$12 sps:$4 sm:$0xff]   ;;  %v3071_v53 = vld [vmem:[#allocation10 + $0x200] ss:$12 sps:$4 sm:$0xff]  }
 0x1a9   :  { %2762 = vmatprep.subr.bf16.mxu0 %v3010_v54  ;;  %v3074_v54 = vld [vmem:[#allocation10 + $0x214] ss:$12 sps:$4 sm:$0xff]  }
 0x1ab   :  { %2215 = vmatpush1.bf16.msra.mxu1 %v3007_v44  ;;  %2763 = vmatpush3.bf16.msra.mxu0 %v3011_v55  ;;  %v3075_v44 = vld [vmem:[#allocation10 + $0x2d8] ss:$12 sps:$4 sm:$0xff]   ;;  %v3072_v55 = vld [vmem:[#allocation10 + $0x210] ss:$12 sps:$4 sm:$0xff]  }
 0x1ac   :  { %2216 = vmatprep.subr.bf16.mxu1 %v3014_v56  ;;  %2764 = vmatprep.subr.bf16.mxu0 %v3015_v39  ;;  %v3076_v56 = vld [vmem:[#allocation10 + $0x218] ss:$12 sps:$4 sm:$0xff]  }
 0x1ad   :  { %v3079_v39 = vld [vmem:[#allocation10 + $0x22c] ss:$12 sps:$4 sm:$0xff]  }
 0x1af   :  { %2217 = vmatpush1.bf16.msra.mxu1 %v3012_v57  ;;  %2765 = vmatpush3.bf16.msra.mxu0 %v3016_v58  ;;  %v3080_v57 = vld [vmem:[#allocation10 + $0x2f0] ss:$12 sps:$4 sm:$0xff]   ;;  %v3077_v58 = vld [vmem:[#allocation10 + $0x228] ss:$12 sps:$4 sm:$0xff]  }
 0x1b0   :  { %2218 = vmatprep.subr.bf16.mxu1 %v3019_v59  ;;  %2766 = vmatprep.subr.bf16.mxu0 %v3020_v61  ;;  %v3081_v59 = vld [vmem:[#allocation10 + $0x230] ss:$12 sps:$4 sm:$0xff]  }
 0x1b1   :  { %v3084_v61 = vld [vmem:[#allocation10 + $0x244] ss:$12 sps:$4 sm:$0xff]  }
 0x1b3   :  { %2219 = vmatpush1.bf16.msra.mxu1 %v3017_v62  ;;  %2767 = vmatpush3.bf16.msra.mxu0 %v3021_v63  ;;  %v3082_v62 = vld [vmem:[#allocation10 + $0x240] ss:$12 sps:$4 sm:$0xff]   ;;  %v3087_v63 = vld [vmem:[#allocation10 + $0x25c] ss:$12 sps:$4 sm:$0xff]  }
 0x1b4   :  { %2220 = vmatprep.subr.bf16.mxu1 %v3024_v1  ;;  %2768 = vmatprep.subr.bf16.mxu0 %v3025_v2  ;;  %v697_v1 = vmax.bf16 %v3255_v3, %v3467_v33  ;;  %v3085_v2 = vld [vmem:[#allocation10 + $0x258] ss:$12 sps:$4 sm:$0xff]   ;;  %v3102_v33 = vld [vmem:[#allocation10 + $0x2d4] ss:$12 sps:$4 sm:$0xff]  }
 0x1b7   :  { %2221 = vmatpush1.bf16.msra.mxu1 %v3022_v5  ;;  %2769 = vmatpush3.bf16.msra.mxu0 %v3026_v6  ;;  %v3090_v5 = vld [vmem:[#allocation10 + $0x274] ss:$12 sps:$4 sm:$0xff]   ;;  %v3088_v6 = vld [vmem:[#allocation10 + $0x270] ss:$12 sps:$4 sm:$0xff]  }
 0x1b8   :  { %2222 = vmatprep.subr.bf16.mxu1 %v3029_v7  ;;  %2770 = vmatprep.subr.bf16.mxu0 %v3030_v60  ;;  %v3093_v7 = vld [vmem:[#allocation10 + $0x28c] ss:$12 sps:$4 sm:$0xff]   ;;  %v3091_v60 = vld [vmem:[#allocation10 + $0x288] ss:$12 sps:$4 sm:$0xff]  }
 0x1bb   :  { %2223 = vmatpush1.bf16.msra.mxu1 %v3027_v9  ;;  %2771 = vmatpush3.bf16.msra.mxu0 %v3031_v10  ;;  %v3094_v9 = vld [vmem:[#allocation10 + $0x2a0] ss:$12 sps:$4 sm:$0xff]   ;;  %v3099_v10 = vld [vmem:[#allocation10 + $0x2bc] ss:$12 sps:$4 sm:$0xff]  }
 0x1bc   :  { %2224 = vmatprep.subr.bf16.mxu1 %v3034_v11  ;;  %2772 = vmatprep.subr.bf16.mxu0 %v3035_v12  ;;  %v3097_v11 = vld [vmem:[#allocation10 + $0x2b8] ss:$12 sps:$4 sm:$0xff]   ;;  %v3100_v12 = vld [vmem:[#allocation10 + $0x2d0] ss:$12 sps:$4 sm:$0xff]  }
 0x1bf   :  { %2225 = vmatpush1.bf16.msra.mxu1 %v3032_v14  ;;  %2773 = vmatpush3.bf16.msra.mxu0 %v3036_v15  ;;  %v3103_v14 = vld [vmem:[#allocation10 + $0x2e8] ss:$12 sps:$4 sm:$0xff]  }
 0x1c0   :  { %2226 = vmatprep.subr.bf16.mxu1 %v3039_v16  ;;  %2774 = vmatprep.subr.bf16.mxu0 %v3040_v17 }
 0x1c3   :  { %2227 = vmatpush1.bf16.msra.mxu1 %v3037_v19  ;;  %2775 = vmatpush3.bf16.msra.mxu0 %v3041_v20 }
 0x1c4   :  { %2237 = vmatprep.subr.bf16.mxu1 %v3044_v21  ;;  %2782 = vmatprep.subr.bf16.mxu0 %v3045_v22 }
 0x1c6   :  { %2229 = vmatmul.mubr.bf16.vlgmr.msra.gmra.mrb[16].mxu1 %v695_v26  ;;  %2311 = vmatmul.mubr.bf16.vlgmr.msra.gmra.mrb[12].mxu0 %v695_v26  ;;  %v2617_v26 = vld.sshfl [vmem:[%s3555_s6] sm:$0x13 pattern:$0x75316420] }
 0x1c7   :  { %2238 = vmatpush1.bf16.msra.mxu1 %v3042_v25  ;;  %2269 = vmatprep.mubr.bf16.mxu1 %v698_v27 }
 0x1c8   :  { %2783 = vmatpush3.bf16.msra.mxu0 %v3046_v29  ;;  %2350 = vmatprep.mubr.bf16.mxu0 %v698_v27  ;;  %v1520_v29 = vrot.slane %v2617_v26, %v3431_v35 }
 0x1c9   :  { %2239 = vmatprep.subr.bf16.mxu1 %v3049_v28  ;;  %2784 = vmatprep.subr.bf16.mxu0 %v3050_v30  ;;  %v1513_v28 = vcombine.high %v2617_v26, %v2617_v26 }
 0x1ca   :  { %v1528_v27 = vcombine.high %v1520_v29, %v1520_v29 }
 0x1cb   :  { %2240 = vmatpush1.bf16.msra.mxu1 %v3047_v31  ;;  %v1527_v31 = vrot.slane %v1513_v28, %v3431_v35 }
 0x1cc   :  { %2785 = vmatpush3.bf16.msra.mxu0 %v3051_v32  ;;  %2241 = vmatprep.subr.bf16.mxu1 %v3054_v34  ;;  %v1544_v30 = vpack.i.b16 %v1528_v27, %v1528_v27 }
 0x1cd   :  { %2786 = vmatprep.subr.bf16.mxu0 %v3055_v36  ;;  %v1530_v36 = vpack.i.b16 %v1520_v29, %v1520_v29 }
 0x1ce   :  { %v1549_v34 = vrot.slane %v1544_v30, %v3442_v42 }
 0x1cf   :  { %2242 = vmatpush1.bf16.msra.mxu1 %v3052_v23  ;;  %v1537_v23 = vpack.i.b16 %v1527_v31, %v1527_v31 }
 0x1d0   :  { %2787 = vmatpush3.bf16.msra.mxu0 %v3056_v37  ;;  %2243 = vmatprep.subr.bf16.mxu1 %v3059_v38  ;;  %v1535_v38 = vrot.slane %v1530_v36, %v3442_v42 }
 0x1d1   :  { %2788 = vmatprep.subr.bf16.mxu0 %v3060_v40 }
 0x1d3   :  { %2244 = vmatpush1.bf16.msra.mxu1 %v3057_v41  ;;  %v1542_v41 = vrot.slane %v1537_v23, %v3442_v42 }
 0x1d4   :  { %2789 = vmatpush3.bf16.msra.mxu0 %v3061_v43  ;;  %2245 = vmatprep.subr.bf16.mxu1 %v3064_v45 }
 0x1d5   :  { %2790 = vmatprep.subr.bf16.mxu0 %v3065_v46 }
 0x1d7   :  { %2246 = vmatpush1.bf16.msra.mxu1 %v3062_v47 }
 0x1d8   :  { %2791 = vmatpush3.bf16.msra.mxu0 %v3066_v48  ;;  %2247 = vmatprep.subr.bf16.mxu1 %v3069_v49  ;;  %v2424_v48 = vsub.s32 1, %v3397_v4  ;;  %v2428_v49 = vsub.s32 2, %v3397_v4 }
 0x1d9   :  { %2792 = vmatprep.subr.bf16.mxu0 %v3070_v50 }
 0x1db   :  { %2248 = vmatpush1.bf16.msra.mxu1 %v3067_v52 }
 0x1dc   :  { %2793 = vmatpush3.bf16.msra.mxu0 %v3071_v53  ;;  %2249 = vmatprep.subr.bf16.mxu1 %v3074_v54  ;;  %v2416_v54 = vld [vmem:[%s3558_s9] sm:$0x7] }
 0x1dd   :  { %2794 = vmatprep.subr.bf16.mxu0 %v3075_v44 }
 0x1df   :  { %2250 = vmatpush1.bf16.msra.mxu1 %v3072_v55 }
 0x1e0   :  { %2795 = vmatpush3.bf16.msra.mxu0 %v3076_v56  ;;  %2251 = vmatprep.subr.bf16.mxu1 %v3079_v39  ;;  %v2421_v56 = vrot.slane %v2416_v54, %v3442_v42 }
 0x1e1   :  { %2796 = vmatprep.subr.bf16.mxu0 %v3080_v57 }
 0x1e3   :  { %2252 = vmatpush1.bf16.msra.mxu1 %v3077_v58  ;;  %v2425_v58 = vrot.slane %v2416_v54, %v2424_v48 }
 0x1e4   :  { %2797 = vmatpush3.bf16.msra.mxu0 %v3081_v59  ;;  %2253 = vmatprep.subr.bf16.mxu1 %v3084_v61  ;;  %v2429_v59 = vrot.slane %v2416_v54, %v2428_v49 }
 0x1e7   :  { %2351 = vmatmul.mubr.bf16.vlgmr.msra.gmra.mrb[16].mxu0 %v697_v1  ;;  %2254 = vmatpush1.bf16.msra.mxu1 %v3082_v62 }
 0x1e8   :  { %2255 = vmatprep.subr.bf16.mxu1 %v3087_v63 }
 0x1eb   :  { %2256 = vmatpush1.bf16.msra.mxu1 %v3085_v2 }
 0x1ec   :  { %2257 = vmatprep.subr.bf16.mxu1 %v3090_v5 }
 0x1ef   :  { %2258 = vmatpush1.bf16.msra.mxu1 %v3088_v6 }
 0x1f0   :  { %2259 = vmatprep.subr.bf16.mxu1 %v3093_v7 }
 0x1f3   :  { %2260 = vmatpush1.bf16.msra.mxu1 %v3091_v60 }
 0x1f4   :  { %2261 = vmatprep.subr.bf16.mxu1 %v3096_v8 }
 0x1f7   :  { %2262 = vmatpush1.bf16.msra.mxu1 %v3094_v9 }
 0x1f8   :  { %2263 = vmatprep.subr.bf16.mxu1 %v3099_v10 }
 0x1fb   :  { %2264 = vmatpush1.bf16.msra.mxu1 %v3097_v11 }
 0x1fc   :  { %2265 = vmatprep.subr.bf16.mxu1 %v3102_v33 }
 0x1ff   :  { %2266 = vmatpush1.bf16.msra.mxu1 %v3100_v12 }
 0x200   :  { %2267 = vmatprep.subr.bf16.mxu1 %v3105_v13 }
 0x203   :  { %2268 = vmatpush1.bf16.msra.mxu1 %v3103_v14 }
 0x206   :  { %2270 = vmatmul.mubr.bf16.vlgmr.msra.gmra.mrb[16].mxu1 %v697_v1 }
 0x239   :  { %v2732_v15 = vpop.f32.mrb[8].mxu1 }
 0x23a   :  { %v2733_v16 = vpop.f32.mrb[9].mxu1 }
 0x23b   :  { %v2734_v17 = vadd.f32 %v2733_v16, %v2732_v15  ;;  %v2735_v51 = vpop.f32.mrb[10].mxu1 }
 0x23c   :  { %v2736_v18 = vpop.f32.mrb[11].mxu1  ;;  %v2714_v51 = vld.sshfl [vmem:[%s3557_s8] sm:$0x13 pattern:$0x75316420] }
 0x23d   :  { %v2377_v18 = vrot.slane %v2714_v51, %v3431_v35 }
 0x23f   :  { %v2387_v26 = vpack.i.b16 %v2377_v18, %v2377_v18 }
 0x241   :  { %v2392_v28 = vrot.slane %v2387_v26, %v3442_v42 }
 0x259   :  { %v2754_v19 = vpop.f32.mrb[12].mxu1 }
 0x25a   :  { %v2755_v20 = vpop.f32.mrb[13].mxu1 }
 0x25b   :  { %v2756_v21 = vadd.f32 %v2755_v20, %v2754_v19  ;;  %v2757_v22 = vpop.f32.mrb[14].mxu1  ;;  %v2385_v19 = vcombine.high %v2377_v18, %v2377_v18  ;;  %v2370_v20 = vcombine.high %v2714_v51, %v2714_v51 }
 0x25c   :  { %v2758_v24 = vpop.f32.mrb[15].mxu1 }
 0x25d   :  { %v1496_v25 = vadd.f32 %v2756_v21, %v2734_v17  ;;  %v2401_v21 = vpack.i.b16 %v2385_v19, %v2385_v19  ;;  %v2384_v22 = vrot.slane %v2370_v20, %v3431_v35  ;;  %v2446_v35 = vld [vmem:[%s3559_s10] sm:$0x7] }
 0x25f   :  { %v1503_v32 = vpack.c.bf16 %v1496_v25, %v1496_v25  ;;  %v2406_v25 = vrot.slane %v2401_v21, %v3442_v42  ;;  %v2394_v29 = vpack.i.b16 %v2384_v22, %v2384_v22 }
 0x261   :  { %v1552_v37 = vadd.bf16 %v1549_v34, %v1503_v32  ;;  %v2399_v31 = vrot.slane %v2394_v29, %v3442_v42 }
 0x263   :  { %v1555_v50 = vmax.bf16 %v3255_v3, %v1552_v37 }
 0x265   :  { %v2415_v57 = vunpack.c.l.bf16 %v1555_v50  ;;  %v2455_v50 = vrot.slane %v2446_v35, %v2424_v48  ;;  %v2715_v48 = vld [vmem:[%s3560_s11] ss:$0 sm:$0xff] }
 0x267   :  { %v2435_v1 = vmul.f32 %v2429_v59, %v2415_v57 }
 0x269   :  { %v2439_v7 = vsel %vm166_vm0, %v2435_v1, 0.0 }
 0x279   :  { %v1414_v40 = vpop.f32.mrb[8].mxu0 }
 0x27a   :  { %v1501_v43 = vpack.c.bf16 %v1414_v40, %v1414_v40  ;;  %v1416_v45 = vpop.f32.mrb[9].mxu0 }
 0x27b   :  { %v1502_v46 = vpack.c.bf16 %v1416_v45, %v1416_v45  ;;  %v1418_v47 = vpop.f32.mrb[10].mxu0  ;;  %v2451_v45 = vrot.slane %v2446_v35, %v3442_v42 }
 0x27c   :  { %v1550_v52 = vadd.bf16 %v1535_v38, %v1501_v43  ;;  %v1419_v53 = vpop.f32.mrb[11].mxu0 }
 0x27d   :  { %v1551_v44 = vadd.bf16 %v1542_v41, %v1502_v46 }
 0x27e   :  { %v1553_v55 = vmax.bf16 %v3255_v3, %v1550_v52  ;;  %v2459_v52 = vrot.slane %v2446_v35, %v2428_v49 }
 0x27f   :  { %v1554_v39 = vmax.bf16 %v3255_v3, %v1551_v44 }
 0x280   :  { %v2413_v61 = vunpack.c.l.bf16 %v1553_v55 }
 0x281   :  { %v2414_v4 = vunpack.c.l.bf16 %v1554_v39 }
 0x282   :  { %v2433_v62 = vmul.f32 %v2421_v56, %v2413_v61 }
 0x283   :  { %v2434_v63 = vmul.f32 %v2425_v58, %v2414_v4 }
 0x284   :  { %v2436_v2 = vsel %vm166_vm0, %v2433_v62, 0.0 }
 0x285   :  { %v2437_v5 = vsel %vm166_vm0, %v2434_v63, 0.0 }
 0x286   :  { %v2438_v6 = vadd.f32 %v2437_v5, %v2436_v2 }
 0x288   :  { %v2440_v60 = vadd.f32 %v2439_v7, %v2438_v6 }
 0x299   :  { %v2776_v8 = vpop.f32.mrb[12].mxu0 }
 0x29a   :  { %v2777_v9 = vpop.f32.mrb[13].mxu0 }
 0x29b   :  { %v2778_v10 = vadd.f32 %v2777_v9, %v2776_v8  ;;  %v2779_v11 = vpop.f32.mrb[14].mxu0 }
 0x29c   :  { %v2780_v33 = vpop.f32.mrb[15].mxu0 }
 0x2ba   :  { %v2798_v12 = vpop.f32.mrb[16].mxu0 }
 0x2bb   :  { %v2799_v13 = vpop.f32.mrb[17].mxu0 }
 0x2bc   :  { %v2800_v14 = vadd.f32 %v2799_v13, %v2798_v12  ;;  %v2801_v15 = vpop.f32.mrb[18].mxu0 }
 0x2bd   :  { %v2802_v16 = vpop.f32.mrb[19].mxu0 }
 0x2be   :  { %v2353_v17 = vadd.f32 %v2800_v14, %v2778_v10 }
 0x2c0   :  { %v2360_v24 = vpack.c.bf16 %v2353_v17, %v2353_v17 }
 0x2c2   :  { %v2409_v27 = vadd.bf16 %v2406_v25, %v2360_v24 }
 0x2c4   :  { %v2412_v37 = vmax.bf16 %v3255_v3, %v2409_v27 }
 0x2c6   :  { %v2445_v47 = vunpack.c.l.bf16 %v2412_v37 }
 0x2c8   :  { %v2465_v56 = vmul.f32 %v2459_v52, %v2445_v47 }
 0x2ca   :  { %v2469_v59 = vsel %vm166_vm0, %v2465_v56, 0.0 }
 0x2d9   :  { %v2271_v30 = vpop.f32.mrb[16].mxu1 }
 0x2da   :  { %v2358_v32 = vpack.c.bf16 %v2271_v30, %v2271_v30  ;;  %v2273_v34 = vpop.f32.mrb[17].mxu1 }
 0x2db   :  { %v2359_v36 = vpack.c.bf16 %v2273_v34, %v2273_v34  ;;  %v2275_v23 = vpop.f32.mrb[18].mxu1 }
 0x2dc   :  { %v2407_v38 = vadd.bf16 %v2392_v28, %v2358_v32  ;;  %v2276_v40 = vpop.f32.mrb[19].mxu1 }
 0x2dd   :  { %v2408_v41 = vadd.bf16 %v2399_v31, %v2359_v36 }
 0x2de   :  { %v2410_v43 = vmax.bf16 %v3255_v3, %v2407_v38 }
 0x2df   :  { %v2411_v46 = vmax.bf16 %v3255_v3, %v2408_v41  ;;  %v2474_v3 = vand.u32 127, %v132_v0 }
 0x2e0   :  { %v2443_v53 = vunpack.c.l.bf16 %v2410_v43 }
 0x2e1   :  { %v2444_v54 = vunpack.c.l.bf16 %v2411_v46  ;;  %vm2476_vm4 = vcmp.eq.s32.totalorder %v2474_v3, 1  ;;  %vm2475_vm5 = vcmp.eq.s32.totalorder %v2474_v3, 0 }
 0x2e2   :  { %v2463_v44 = vmul.f32 %v2451_v45, %v2443_v53 }
 0x2e3   :  { %v2464_v55 = vmul.f32 %v2455_v50, %v2444_v54 }
 0x2e4   :  { %v2466_v39 = vsel %vm166_vm0, %v2463_v44, 0.0 }
 0x2e5   :  { %v2467_v57 = vsel %vm166_vm0, %v2464_v55, 0.0 }
 0x2e6   :  { %v2468_v58 = vadd.f32 %v2467_v57, %v2466_v39 }
 0x2e8   :  { %v2470_v61 = vadd.f32 %v2469_v59, %v2468_v58 }
 0x2ea   :  { %2471 = vadd.xlane.f32.xlu0 %v2470_v61 }
 0x2ee   :  { %2441 = vadd.xlane.f32.xlu0 %v2440_v60 }
 0x377   :  { %v2472_v42 = vpop.xlane.xlu0 %2471 }
 0x378   :  { %v2477_v49 = vsel %vm2476_vm4, %v2472_v42, 0.0 }
 0x37b   :  { %v2442_v4 = vpop.xlane.xlu0 %2441 }
 0x37c   :  { %v2478_v62 = vsel %vm2475_vm5, %v2442_v4, %v2477_v49 }
 0x37d   :  { %v2486_v63 = vadd.f32 %v2715_v48, %v2478_v62 }
 0x37f   :  { %2488 = vst.msk [vmem:[%s3561_s12] sm:$0x3] %vm2487_vm6, %v2486_v63 }
 0x380   :  { %2493 = vsyncpa [#allocation3], 1 }
 0x381   :  { %2494 = vsyncpa [#allocation5], 1 }
 0x382   :  { %2495 = vsyncpa [#allocation8], 1 }
 0x383   :  { %2496 = vsyncpa [#allocation11], 1 }

</bundles_post_ra>
